<compile_context>
chip_gen: v6e
topology: v6e:2x2x1
jax: 0.10.0
libtpu: 0.0.40
codegen_flags: <defaults>
</compile_context>

<pallas_src>
import math
from functools import partial

import jax
import jax.numpy as jnp
from jax.experimental import pallas as pl
from jax.experimental.pallas import tpu as pltpu


def _pick_tile_rows(Ho, Wq, Cin, Cout, *, budget_bytes=4 << 20, max_rows=8):
    """Largest output-row tile whose per-step working set fits the budget.

    Working set per grid step: 2x input tile ((TH+2)*Wq*4Cin bf16, double
    buffered) + 2x output tile (TH*Wq*Cout bf16) + f32 accumulator.  A 4 MiB
    budget leaves ample headroom inside v7x's 32 MiB scoped VMEM.  max_rows
    keeps several grid steps alive even for one small image, so the pipeline
    has work to overlap and both v7x TensorCores get tiles at batch size 1.
    """
    cap = max(1, min(Ho, max_rows))
    feasible = 1
    for th in range(1, cap + 1):
        in_b = (th + 2) * Wq * 4 * Cin * 2
        out_b = th * Wq * Cout * 2
        acc_b = th * Wq * Cout * 4
        if 2 * in_b + 2 * out_b + acc_b <= budget_bytes:
            feasible = th
    # prefer a divisor of Ho (no padded garbage rows), but never halve the tile
    for th in range(feasible, max(1, feasible // 2), -1):
        if Ho % th == 0:
            return th
    return feasible
    # TODO(synk): also tile columns for extreme widths where even one output
    # row exceeds the budget.


def _conv_tile_kernel(x_ref, w_ref, b_ref, o_ref, *, tile_rows, Wq, Cin, Cout):
    """One (batch, row-tile) grid step of the 3x3/stride-2 conv + bias + ReLU.

    x_ref: (1, (tile_rows+2)*Wq, 4*Cin) bf16 -- parity-packed input window,
           spatially flattened; per-pixel channel order is [p10,p00,p01,p11]
           (row/col parity planes), so every offset group below is a
           contiguous lane slice.
    w_ref: (9*Cin, Cout) bf16 -- taps regrouped to match the 4 offset groups.
    b_ref: (1, Cout) f32
    o_ref: (1, tile_rows*Wq, Cout) bf16 -- column Wo of each output row is a
           junk column the wrapper slices off (Wq = Wo + 1).
    """
    M = tile_rows * Wq
    # (row offset a, col offset b, lane start, lane len, weight-row start)
    plan = (
        (0, 0, 0,   4 * Cin, 0 * Cin),   # taps (0,0) (0,1) (1,0) (1,1)
        (0, 1, 0,   2 * Cin, 4 * Cin),   # taps (0,2) (1,2)
        (1, 0, Cin, 2 * Cin, 6 * Cin),   # taps (2,0) (2,1)
        (1, 1, Cin, 1 * Cin, 8 * Cin),   # tap  (2,2)
    )
    acc = jnp.zeros((M, Cout), jnp.float32)
    for a, b, cs, cl, ks in plan:
        start = a * Wq + b                               # static offset
        win = x_ref[0, start:start + M, cs:cs + cl]      # (M, cl) bf16
        acc = acc + jnp.dot(win, w_ref[ks:ks + cl, :],
                            preferred_element_type=jnp.float32)
    acc = acc + b_ref[...]                               # bias broadcast
    o_ref[0] = jnp.maximum(acc, 0.0).astype(o_ref.dtype)


def conv3x3_s2_relu(x_nhwc, w, b):
    """3x3 / stride-2 / pad-1 conv + bias + ReLU (bf16 MXU, f32 accumulate).

    x_nhwc: (B, H, W, Cin) float (cast to bf16); w: (3,3,Cin,Cout) f32;
    b: (Cout,) f32.  Returns (B, Ho, Wo, Cout) bf16, Ho=ceil(H/2), Wo=ceil(W/2).
    """
    B, H, W, Cin = x_nhwc.shape
    Cout = w.shape[-1]
    Ho, Wo = (H + 1) // 2, (W + 1) // 2
    Wq = Wo + 1
    TH = _pick_tile_rows(Ho, Wq, Cin, Cout)
    nT = -(-Ho // TH)                    # ceil
    R = nT * TH                          # output rows actually computed

    # ---- parity-packed layout (one XLA transform, lane-dense 4*Cin) --------
    # TODO(synk): fold this repack into the previous layer's output store to
    # remove the remaining ~1x activation HBM round-trip per layer.
    xb = x_nhwc.astype(jnp.bfloat16)
    Hp, Wp = 2 * (R + 2), 2 * Wq
    xp = jnp.pad(xb, ((0, 0), (1, Hp - 1 - H), (1, Wp - 1 - W), (0, 0)))
    p = xp.reshape(B, R + 2, 2, Wq, 2, Cin)
    packed = jnp.concatenate(
        [p[:, :, 1, :, 0, :],            # p10
         p[:, :, 0, :, 0, :],            # p00
         p[:, :, 0, :, 1, :],            # p01
         p[:, :, 1, :, 1, :]],           # p11
        axis=-1)                         # (B, R+2, Wq, 4*Cin)

    # Overlapping row windows (1 halo + 1 overhang row per tile) gathered into
    # disjoint per-tile blocks so BlockSpec can pipeline them; duplication is
    # 2/TH of the input bytes.
    row_idx = jnp.arange(nT)[:, None] * TH + jnp.arange(TH + 2)[None, :]
    tiles = packed[:, row_idx]                       # (B, nT, TH+2, Wq, 4Cin)
    tiles = tiles.reshape(B * nT, (TH + 2) * Wq, 4 * Cin)

    # Weights regrouped by the 4 (row,col) offsets; K rows ordered to match the
    # packed-channel slices used in the kernel.  Total K = 9*Cin exactly.
    wb = w.astype(jnp.bfloat16)
    w_pack = jnp.concatenate(
        [wb[1, 0], wb[0, 0], wb[0, 1], wb[1, 1],     # offset (0,0)
         wb[1, 2], wb[0, 2],                         # offset (0,1)
         wb[2, 0], wb[2, 1],                         # offset (1,0)
         wb[2, 2]],                                  # offset (1,1)
        axis=0)                                      # (9*Cin, Cout)
    b2 = b.reshape(1, Cout).astype(jnp.float32)

    M = TH * Wq
    kernel = partial(_conv_tile_kernel, tile_rows=TH, Wq=Wq, Cin=Cin, Cout=Cout)
    flops = 2 * B * nT * M * 9 * Cin * Cout
    bytes_accessed = (tiles.size * 2 + w_pack.size * 2 + b2.size * 4
                      + B * nT * M * Cout * 2)

    out = pl.pallas_call(
        kernel,
        out_shape=jax.ShapeDtypeStruct((B * nT, M, Cout), jnp.bfloat16),
        grid=(B * nT,),
        in_specs=[
            pl.BlockSpec((1, (TH + 2) * Wq, 4 * Cin), lambda t: (t, 0, 0)),
            pl.BlockSpec((9 * Cin, Cout), lambda t: (0, 0)),     # resident
            pl.BlockSpec((1, Cout), lambda t: (0, 0)),           # resident
        ],
        out_specs=pl.BlockSpec((1, M, Cout), lambda t: (t, 0, 0)),
        compiler_params=pltpu.CompilerParams(
            dimension_semantics=("parallel",),       # batch x row tiles
            vmem_limit_bytes=32 * 1024 * 1024),
        cost_estimate=pl.CostEstimate(flops=flops, transcendentals=0,
                                      bytes_accessed=bytes_accessed),
    )(tiles, w_pack, b2)

    # Drop the junk column / padded rows; native channel count is kept (no
    # 128-lane padding, no channel slice, no re-pad in the next layer).
    return out.reshape(B, R, Wq, Cout)[:, :Ho, :Wo, :]


# -----------------------------------------------------------------------------
# Synthetic BackboneBase
# -----------------------------------------------------------------------------
class BackboneBasePallas:
    """JAX/Pallas re-implementation of BackboneBase.forward.

    The backbone is a deterministic stand-in ResNet: five stride-2 3x3 convs
    (conv1, layer1..layer4).  With return_interm_layers=True the forward
    returns {'0': layer2, '1': layer3, '2': layer4} at strides 8/16/32,
    mirroring the PyTorch module.
    """

    def __init__(self, key, in_channels=4, return_interm_layers=True):
        plan = [in_channels, 8, 16, 32, 64, 128]
        self.params = []
        for li in range(5):
            cin, cout = plan[li], plan[li + 1]
            kw, kb, key = jax.random.split(key, 3)
            scale = 1.0 / math.sqrt(9 * cin)
            w = jax.random.normal(kw, (3, 3, cin, cout), jnp.float32) * scale
            bb = jax.random.normal(kb, (cout,), jnp.float32) * 0.01
            self.params.append((w, bb))

        # NOTE: requires_grad_ freezing in the reference __init__ is
        # training-time bookkeeping only; it has no effect on the forward.
        if return_interm_layers:
            self.return_layers = {2: '0', 3: '1', 4: '2'}
            self.strides = [8, 16, 32]
            self.num_channels = [32, 64, 128]
        else:
            self.return_layers = {4: '0'}
            self.strides = [32]
            self.num_channels = [128]

    def forward(self, tensors_nchw, mask):
        """tensors_nchw: (B, C, H, W) float32; mask: (B, H, W) bool."""
        x = jnp.transpose(tensors_nchw, (0, 2, 3, 1))     # NCHW -> NHWC once
        feats_nhwc = {}
        for li, (w, b) in enumerate(self.params):         # conv1, layer1..4
            x = conv3x3_s2_relu(x, w, b)                  # NHWC bf16 chain
            if li in self.return_layers:
                feats_nhwc[self.return_layers[li]] = x

        out = {}
        for name, feat in feats_nhwc.items():
            # single transpose back to NCHW + f32 cast, only for returned maps
            f = jnp.transpose(feat, (0, 3, 1, 2)).astype(jnp.float32)
            hf, wf = f.shape[-2], f.shape[-1]
            # F.interpolate(mode='nearest', size=(hf,wf)): src = floor(dst*in/out)
            # -> pure index gather, kept as JAX glue (no arithmetic).
            ridx = (jnp.arange(hf) * mask.shape[1]) // hf
            cidx = (jnp.arange(wf) * mask.shape[2]) // wf
            m = mask[:, ridx][:, :, cidx].astype(jnp.bool_)
            out[name] = (f, m)                            # NestedTensor(feat, mask)
        return out


def _reference_forward(params, return_layers, tensors_nchw):
    """Pure-JAX (lax.conv, f32) reference mirroring the kernel's bf16 casts."""
    x = jnp.transpose(tensors_nchw, (0, 2, 3, 1))
    feats = {}
    for li, (w, b) in enumerate(params):
        xin = x.astype(jnp.bfloat16).astype(jnp.float32)
        win = w.astype(jnp.bfloat16).astype(jnp.float32)
        y = jax.lax.conv_general_dilated(
            xin, win, window_strides=(2, 2), padding=((1, 1), (1, 1)),
            dimension_numbers=('NHWC', 'HWIO', 'NHWC'),
            precision=jax.lax.Precision.HIGHEST)
        y = jnp.maximum(y + b, 0.0)
        x = y.astype(jnp.bfloat16)                        # same per-layer store
        if li in return_layers:
            feats[return_layers[li]] = jnp.transpose(
                x.astype(jnp.float32), (0, 3, 1, 2))
    return feats


if __name__ == "__main__":
    key = jax.random.PRNGKey(0)
    kx, kp = jax.random.split(key)

    B, C, H, W = 2, 4, 32, 32
    tensors = jax.random.normal(kx, (B, C, H, W), jnp.float32)
    # DETR-style padding mask: True on padded pixels (right half of each image).
    mask = jnp.zeros((B, H, W), jnp.bool_).at[:, :, W // 2:].set(True)

    model = BackboneBasePallas(kp, in_channels=C, return_interm_layers=True)
    fwd = jax.jit(model.forward)              # fuse the thin pad/reshape glue
    out = fwd(tensors, mask)

    ref = _reference_forward(model.params, model.return_layers, tensors)

    expected = {'0': (32, 4), '1': (64, 2), '2': (128, 1)}
    for name, (feat, m) in out.items():
        feat = jax.block_until_ready(feat)
        m = jax.block_until_ready(m)
        ch, sp = expected[name]
        assert feat.shape == (B, ch, sp, sp), (name, feat.shape)
        assert feat.dtype == jnp.float32
        assert m.shape == (B, sp, sp) and m.dtype == jnp.bool_, (name, m.shape)
        err = float(jnp.max(jnp.abs(feat - ref[name])))
        assert jnp.allclose(feat, ref[name], rtol=1e-2, atol=1e-2), (name, err)

    print("KERNEL_OK")
</pallas_src>

<mosaic_0001>
module attributes {stable_mosaic.version = 11 : i64} {
  func.func @_conv_tile_kernel(%arg0: i32, %arg1: memref<1x170x16xbf16, #tpu.memory_space<vmem>>, %arg2: memref<36x8xbf16, #tpu.memory_space<vmem>>, %arg3: memref<1x8xf32, #tpu.memory_space<vmem>>, %arg4: memref<1x136x8xbf16, #tpu.memory_space<vmem>>) attributes {dimension_semantics = [#tpu.dimension_semantics<parallel>], iteration_bounds = array<i64: 4>, scalar_prefetch = 0 : i64, scratch_operands = 0 : i64, tpu.core_type = #tpu.core_type<tc>, window_params = [{transform_indices = @transform_0, window_bounds = array<i64: 1, 170, 16>}, {pipeline_mode = #tpu.pipeline_mode<synchronous>, transform_indices = @transform_1, window_bounds = array<i64: 36, 8>}, {pipeline_mode = #tpu.pipeline_mode<synchronous>, transform_indices = @transform_2, window_bounds = array<i64: 1, 8>}, {transform_indices = @transform_3, window_bounds = array<i64: 1, 136, 8>}]} {
    %cst = arith.constant 0.000000e+00 : f32
    %0 = vector.broadcast %cst : f32 to vector<136x8xf32>
    %c0 = arith.constant 0 : index
    %c0_0 = arith.constant 0 : index
    %c0_1 = arith.constant 0 : index
    %1 = vector.load %arg1[%c0, %c0_0, %c0_1] : memref<1x170x16xbf16, #tpu.memory_space<vmem>>, vector<1x136x16xbf16>
    %2 = vector.shape_cast %1 : vector<1x136x16xbf16> to vector<136x16xbf16>
    %c0_2 = arith.constant 0 : index
    %c0_3 = arith.constant 0 : index
    %3 = vector.load %arg2[%c0_2, %c0_3] : memref<36x8xbf16, #tpu.memory_space<vmem>>, vector<16x8xbf16>
    %cst_4 = arith.constant dense<0.000000e+00> : vector<136x8xf32>
    %4 = tpu.matmul %2, %3, %cst_4 {dimension_numbers = #tpu.dot_dimension_numbers<[1], [0], [0], [1], [0, 0, 1, 1], [], []>} : vector<136x16xbf16>, vector<16x8xbf16>, vector<136x8xf32> -> vector<136x8xf32>
    %5 = arith.addf %0, %4 : vector<136x8xf32>
    %c0_5 = arith.constant 0 : index
    %c1 = arith.constant 1 : index
    %c0_6 = arith.constant 0 : index
    %6 = vector.load %arg1[%c0_5, %c1, %c0_6] : memref<1x170x16xbf16, #tpu.memory_space<vmem>>, vector<1x136x8xbf16>
    %7 = vector.shape_cast %6 : vector<1x136x8xbf16> to vector<136x8xbf16>
    %c16 = arith.constant 16 : index
    %c0_7 = arith.constant 0 : index
    %8 = vector.load %arg2[%c16, %c0_7] : memref<36x8xbf16, #tpu.memory_space<vmem>>, vector<8x8xbf16>
    %cst_8 = arith.constant dense<0.000000e+00> : vector<136x8xf32>
    %9 = tpu.matmul %7, %8, %cst_8 {dimension_numbers = #tpu.dot_dimension_numbers<[1], [0], [0], [1], [0, 0, 1, 1], [], []>} : vector<136x8xbf16>, vector<8x8xbf16>, vector<136x8xf32> -> vector<136x8xf32>
    %10 = arith.addf %5, %9 : vector<136x8xf32>
    %c0_9 = arith.constant 0 : index
    %c17 = arith.constant 17 : index
    %c4 = arith.constant 4 : index
    %11 = vector.load %arg1[%c0_9, %c17, %c4] : memref<1x170x16xbf16, #tpu.memory_space<vmem>>, vector<1x136x8xbf16>
    %12 = vector.shape_cast %11 : vector<1x136x8xbf16> to vector<136x8xbf16>
    %c24 = arith.constant 24 : index
    %c0_10 = arith.constant 0 : index
    %13 = vector.load %arg2[%c24, %c0_10] : memref<36x8xbf16, #tpu.memory_space<vmem>>, vector<8x8xbf16>
    %cst_11 = arith.constant dense<0.000000e+00> : vector<136x8xf32>
    %14 = tpu.matmul %12, %13, %cst_11 {dimension_numbers = #tpu.dot_dimension_numbers<[1], [0], [0], [1], [0, 0, 1, 1], [], []>} : vector<136x8xbf16>, vector<8x8xbf16>, vector<136x8xf32> -> vector<136x8xf32>
    %15 = arith.addf %10, %14 : vector<136x8xf32>
    %c0_12 = arith.constant 0 : index
    %c18 = arith.constant 18 : index
    %c4_13 = arith.constant 4 : index
    %16 = vector.load %arg1[%c0_12, %c18, %c4_13] : memref<1x170x16xbf16, #tpu.memory_space<vmem>>, vector<1x136x4xbf16>
    %17 = vector.shape_cast %16 : vector<1x136x4xbf16> to vector<136x4xbf16>
    %c32 = arith.constant 32 : index
    %c0_14 = arith.constant 0 : index
    %18 = vector.load %arg2[%c32, %c0_14] : memref<36x8xbf16, #tpu.memory_space<vmem>>, vector<4x8xbf16>
    %cst_15 = arith.constant dense<0.000000e+00> : vector<136x8xf32>
    %19 = tpu.matmul %17, %18, %cst_15 {dimension_numbers = #tpu.dot_dimension_numbers<[1], [0], [0], [1], [0, 0, 1, 1], [], []>} : vector<136x4xbf16>, vector<4x8xbf16>, vector<136x8xf32> -> vector<136x8xf32>
    %20 = arith.addf %15, %19 : vector<136x8xf32>
    %c0_16 = arith.constant 0 : index
    %c0_17 = arith.constant 0 : index
    %21 = vector.load %arg3[%c0_16, %c0_17] : memref<1x8xf32, #tpu.memory_space<vmem>>, vector<1x8xf32>
    %22 = vector.broadcast %21 : vector<1x8xf32> to vector<136x8xf32>
    %23 = arith.addf %20, %22 : vector<136x8xf32>
    %cst_18 = arith.constant 0.000000e+00 : f32
    %24 = vector.broadcast %cst_18 : f32 to vector<136x8xf32>
    %25 = arith.maximumf %23, %24 : vector<136x8xf32>
    %26 = arith.truncf %25 : vector<136x8xf32> to vector<136x8xbf16>
    %c0_19 = arith.constant 0 : index
    %c0_20 = arith.constant 0 : index
    %c0_21 = arith.constant 0 : index
    %27 = vector.load %arg4[%c0_19, %c0_20, %c0_21] : memref<1x136x8xbf16, #tpu.memory_space<vmem>>, vector<1x136x8xbf16>
    %28 = vector.shape_cast %27 : vector<1x136x8xbf16> to vector<136x8xbf16>
    %29 = vector.shape_cast %26 : vector<136x8xbf16> to vector<1x136x8xbf16>
    tpu.vector_store %arg4[%c0_19, %c0_20, %c0_21], %29 {strides = array<i32>} : memref<1x136x8xbf16, #tpu.memory_space<vmem>>, vector<1x136x8xbf16>,
    return
  }
  func.func @transform_0(%arg0: i32) -> (i32, i32, i32) {
    %c0_i32 = arith.constant 0 : i32
    %c0_i32_0 = arith.constant 0 : i32
    %c0_i32_1 = arith.constant 0 : i32
    return %arg0, %c0_i32, %c0_i32_0 : i32, i32, i32
  }
  func.func @transform_1(%arg0: i32) -> (i32, i32) {
    %c0_i32 = arith.constant 0 : i32
    %c0_i32_0 = arith.constant 0 : i32
    %c0_i32_1 = arith.constant 0 : i32
    return %c0_i32, %c0_i32_0 : i32, i32
  }
  func.func @transform_2(%arg0: i32) -> (i32, i32) {
    %c0_i32 = arith.constant 0 : i32
    %c0_i32_0 = arith.constant 0 : i32
    %c0_i32_1 = arith.constant 0 : i32
    return %c0_i32, %c0_i32_0 : i32, i32
  }
  func.func @transform_3(%arg0: i32) -> (i32, i32, i32) {
    %c0_i32 = arith.constant 0 : i32
    %c0_i32_0 = arith.constant 0 : i32
    %c0_i32_1 = arith.constant 0 : i32
    return %arg0, %c0_i32, %c0_i32_0 : i32, i32, i32
  }
}

module attributes {stable_mosaic.version = 11 : i64} {
  func.func @_conv_tile_kernel(%arg0: i32, %arg1: memref<1x90x32xbf16, #tpu.memory_space<vmem>>, %arg2: memref<72x16xbf16, #tpu.memory_space<vmem>>, %arg3: memref<1x16xf32, #tpu.memory_space<vmem>>, %arg4: memref<1x72x16xbf16, #tpu.memory_space<vmem>>) attributes {dimension_semantics = [#tpu.dimension_semantics<parallel>], iteration_bounds = array<i64: 2>, scalar_prefetch = 0 : i64, scratch_operands = 0 : i64, tpu.core_type = #tpu.core_type<tc>, window_params = [{transform_indices = @transform_0, window_bounds = array<i64: 1, 90, 32>}, {pipeline_mode = #tpu.pipeline_mode<synchronous>, transform_indices = @transform_1, window_bounds = array<i64: 72, 16>}, {pipeline_mode = #tpu.pipeline_mode<synchronous>, transform_indices = @transform_2, window_bounds = array<i64: 1, 16>}, {transform_indices = @transform_3, window_bounds = array<i64: 1, 72, 16>}]} {
    %cst = arith.constant 0.000000e+00 : f32
    %0 = vector.broadcast %cst : f32 to vector<72x16xf32>
    %c0 = arith.constant 0 : index
    %c0_0 = arith.constant 0 : index
    %c0_1 = arith.constant 0 : index
    %1 = vector.load %arg1[%c0, %c0_0, %c0_1] : memref<1x90x32xbf16, #tpu.memory_space<vmem>>, vector<1x72x32xbf16>
    %2 = vector.shape_cast %1 : vector<1x72x32xbf16> to vector<72x32xbf16>
    %c0_2 = arith.constant 0 : index
    %c0_3 = arith.constant 0 : index
    %3 = vector.load %arg2[%c0_2, %c0_3] : memref<72x16xbf16, #tpu.memory_space<vmem>>, vector<32x16xbf16>
    %cst_4 = arith.constant dense<0.000000e+00> : vector<72x16xf32>
    %4 = tpu.matmul %2, %3, %cst_4 {dimension_numbers = #tpu.dot_dimension_numbers<[1], [0], [0], [1], [0, 0, 1, 1], [], []>} : vector<72x32xbf16>, vector<32x16xbf16>, vector<72x16xf32> -> vector<72x16xf32>
    %5 = arith.addf %0, %4 : vector<72x16xf32>
    %c0_5 = arith.constant 0 : index
    %c1 = arith.constant 1 : index
    %c0_6 = arith.constant 0 : index
    %6 = vector.load %arg1[%c0_5, %c1, %c0_6] : memref<1x90x32xbf16, #tpu.memory_space<vmem>>, vector<1x72x16xbf16>
    %7 = vector.shape_cast %6 : vector<1x72x16xbf16> to vector<72x16xbf16>
    %c32 = arith.constant 32 : index
    %c0_7 = arith.constant 0 : index
    %8 = vector.load %arg2[%c32, %c0_7] : memref<72x16xbf16, #tpu.memory_space<vmem>>, vector<16x16xbf16>
    %cst_8 = arith.constant dense<0.000000e+00> : vector<72x16xf32>
    %9 = tpu.matmul %7, %8, %cst_8 {dimension_numbers = #tpu.dot_dimension_numbers<[1], [0], [0], [1], [0, 0, 1, 1], [], []>} : vector<72x16xbf16>, vector<16x16xbf16>, vector<72x16xf32> -> vector<72x16xf32>
    %10 = arith.addf %5, %9 : vector<72x16xf32>
    %c0_9 = arith.constant 0 : index
    %c9 = arith.constant 9 : index
    %c8 = arith.constant 8 : index
    %11 = vector.load %arg1[%c0_9, %c9, %c8] : memref<1x90x32xbf16, #tpu.memory_space<vmem>>, vector<1x72x16xbf16>
    %12 = vector.shape_cast %11 : vector<1x72x16xbf16> to vector<72x16xbf16>
    %c48 = arith.constant 48 : index
    %c0_10 = arith.constant 0 : index
    %13 = vector.load %arg2[%c48, %c0_10] : memref<72x16xbf16, #tpu.memory_space<vmem>>, vector<16x16xbf16>
    %cst_11 = arith.constant dense<0.000000e+00> : vector<72x16xf32>
    %14 = tpu.matmul %12, %13, %cst_11 {dimension_numbers = #tpu.dot_dimension_numbers<[1], [0], [0], [1], [0, 0, 1, 1], [], []>} : vector<72x16xbf16>, vector<16x16xbf16>, vector<72x16xf32> -> vector<72x16xf32>
    %15 = arith.addf %10, %14 : vector<72x16xf32>
    %c0_12 = arith.constant 0 : index
    %c10 = arith.constant 10 : index
    %c8_13 = arith.constant 8 : index
    %16 = vector.load %arg1[%c0_12, %c10, %c8_13] : memref<1x90x32xbf16, #tpu.memory_space<vmem>>, vector<1x72x8xbf16>
    %17 = vector.shape_cast %16 : vector<1x72x8xbf16> to vector<72x8xbf16>
    %c64 = arith.constant 64 : index
    %c0_14 = arith.constant 0 : index
    %18 = vector.load %arg2[%c64, %c0_14] : memref<72x16xbf16, #tpu.memory_space<vmem>>, vector<8x16xbf16>
    %cst_15 = arith.constant dense<0.000000e+00> : vector<72x16xf32>
    %19 = tpu.matmul %17, %18, %cst_15 {dimension_numbers = #tpu.dot_dimension_numbers<[1], [0], [0], [1], [0, 0, 1, 1], [], []>} : vector<72x8xbf16>, vector<8x16xbf16>, vector<72x16xf32> -> vector<72x16xf32>
    %20 = arith.addf %15, %19 : vector<72x16xf32>
    %c0_16 = arith.constant 0 : index
    %c0_17 = arith.constant 0 : index
    %21 = vector.load %arg3[%c0_16, %c0_17] : memref<1x16xf32, #tpu.memory_space<vmem>>, vector<1x16xf32>
    %22 = vector.broadcast %21 : vector<1x16xf32> to vector<72x16xf32>
    %23 = arith.addf %20, %22 : vector<72x16xf32>
    %cst_18 = arith.constant 0.000000e+00 : f32
    %24 = vector.broadcast %cst_18 : f32 to vector<72x16xf32>
    %25 = arith.maximumf %23, %24 : vector<72x16xf32>
    %26 = arith.truncf %25 : vector<72x16xf32> to vector<72x16xbf16>
    %c0_19 = arith.constant 0 : index
    %c0_20 = arith.constant 0 : index
    %c0_21 = arith.constant 0 : index
    %27 = vector.load %arg4[%c0_19, %c0_20, %c0_21] : memref<1x72x16xbf16, #tpu.memory_space<vmem>>, vector<1x72x16xbf16>
    %28 = vector.shape_cast %27 : vector<1x72x16xbf16> to vector<72x16xbf16>
    %29 = vector.shape_cast %26 : vector<72x16xbf16> to vector<1x72x16xbf16>
    tpu.vector_store %arg4[%c0_19, %c0_20, %c0_21], %29 {strides = array<i32>} : memref<1x72x16xbf16, #tpu.memory_space<vmem>>, vector<1x72x16xbf16>,
    return
  }
  func.func @transform_0(%arg0: i32) -> (i32, i32, i32) {
    %c0_i32 = arith.constant 0 : i32
    %c0_i32_0 = arith.constant 0 : i32
    %c0_i32_1 = arith.constant 0 : i32
    return %arg0, %c0_i32, %c0_i32_0 : i32, i32, i32
  }
  func.func @transform_1(%arg0: i32) -> (i32, i32) {
    %c0_i32 = arith.constant 0 : i32
    %c0_i32_0 = arith.constant 0 : i32
    %c0_i32_1 = arith.constant 0 : i32
    return %c0_i32, %c0_i32_0 : i32, i32
  }
  func.func @transform_2(%arg0: i32) -> (i32, i32) {
    %c0_i32 = arith.constant 0 : i32
    %c0_i32_0 = arith.constant 0 : i32
    %c0_i32_1 = arith.constant 0 : i32
    return %c0_i32, %c0_i32_0 : i32, i32
  }
  func.func @transform_3(%arg0: i32) -> (i32, i32, i32) {
    %c0_i32 = arith.constant 0 : i32
    %c0_i32_0 = arith.constant 0 : i32
    %c0_i32_1 = arith.constant 0 : i32
    return %arg0, %c0_i32, %c0_i32_0 : i32, i32, i32
  }
}

module attributes {stable_mosaic.version = 11 : i64} {
  func.func @_conv_tile_kernel(%arg0: i32, %arg1: memref<1x30x64xbf16, #tpu.memory_space<vmem>>, %arg2: memref<144x32xbf16, #tpu.memory_space<vmem>>, %arg3: memref<1x32xf32, #tpu.memory_space<vmem>>, %arg4: memref<1x20x32xbf16, #tpu.memory_space<vmem>>) attributes {dimension_semantics = [#tpu.dimension_semantics<parallel>], iteration_bounds = array<i64: 2>, scalar_prefetch = 0 : i64, scratch_operands = 0 : i64, tpu.core_type = #tpu.core_type<tc>, window_params = [{transform_indices = @transform_0, window_bounds = array<i64: 1, 30, 64>}, {pipeline_mode = #tpu.pipeline_mode<synchronous>, transform_indices = @transform_1, window_bounds = array<i64: 144, 32>}, {pipeline_mode = #tpu.pipeline_mode<synchronous>, transform_indices = @transform_2, window_bounds = array<i64: 1, 32>}, {transform_indices = @transform_3, window_bounds = array<i64: 1, 20, 32>}]} {
    %cst = arith.constant 0.000000e+00 : f32
    %0 = vector.broadcast %cst : f32 to vector<20x32xf32>
    %c0 = arith.constant 0 : index
    %c0_0 = arith.constant 0 : index
    %c0_1 = arith.constant 0 : index
    %1 = vector.load %arg1[%c0, %c0_0, %c0_1] : memref<1x30x64xbf16, #tpu.memory_space<vmem>>, vector<1x20x64xbf16>
    %2 = vector.shape_cast %1 : vector<1x20x64xbf16> to vector<20x64xbf16>
    %c0_2 = arith.constant 0 : index
    %c0_3 = arith.constant 0 : index
    %3 = vector.load %arg2[%c0_2, %c0_3] : memref<144x32xbf16, #tpu.memory_space<vmem>>, vector<64x32xbf16>
    %cst_4 = arith.constant dense<0.000000e+00> : vector<20x32xf32>
    %4 = tpu.matmul %2, %3, %cst_4 {dimension_numbers = #tpu.dot_dimension_numbers<[1], [0], [0], [1], [0, 0, 1, 1], [], []>} : vector<20x64xbf16>, vector<64x32xbf16>, vector<20x32xf32> -> vector<20x32xf32>
    %5 = arith.addf %0, %4 : vector<20x32xf32>
    %c0_5 = arith.constant 0 : index
    %c1 = arith.constant 1 : index
    %c0_6 = arith.constant 0 : index
    %6 = vector.load %arg1[%c0_5, %c1, %c0_6] : memref<1x30x64xbf16, #tpu.memory_space<vmem>>, vector<1x20x32xbf16>
    %7 = vector.shape_cast %6 : vector<1x20x32xbf16> to vector<20x32xbf16>
    %c64 = arith.constant 64 : index
    %c0_7 = arith.constant 0 : index
    %8 = vector.load %arg2[%c64, %c0_7] : memref<144x32xbf16, #tpu.memory_space<vmem>>, vector<32x32xbf16>
    %cst_8 = arith.constant dense<0.000000e+00> : vector<20x32xf32>
    %9 = tpu.matmul %7, %8, %cst_8 {dimension_numbers = #tpu.dot_dimension_numbers<[1], [0], [0], [1], [0, 0, 1, 1], [], []>} : vector<20x32xbf16>, vector<32x32xbf16>, vector<20x32xf32> -> vector<20x32xf32>
    %10 = arith.addf %5, %9 : vector<20x32xf32>
    %c0_9 = arith.constant 0 : index
    %c5 = arith.constant 5 : index
    %c16 = arith.constant 16 : index
    %11 = vector.load %arg1[%c0_9, %c5, %c16] : memref<1x30x64xbf16, #tpu.memory_space<vmem>>, vector<1x20x32xbf16>
    %12 = vector.shape_cast %11 : vector<1x20x32xbf16> to vector<20x32xbf16>
    %c96 = arith.constant 96 : index
    %c0_10 = arith.constant 0 : index
    %13 = vector.load %arg2[%c96, %c0_10] : memref<144x32xbf16, #tpu.memory_space<vmem>>, vector<32x32xbf16>
    %cst_11 = arith.constant dense<0.000000e+00> : vector<20x32xf32>
    %14 = tpu.matmul %12, %13, %cst_11 {dimension_numbers = #tpu.dot_dimension_numbers<[1], [0], [0], [1], [0, 0, 1, 1], [], []>} : vector<20x32xbf16>, vector<32x32xbf16>, vector<20x32xf32> -> vector<20x32xf32>
    %15 = arith.addf %10, %14 : vector<20x32xf32>
    %c0_12 = arith.constant 0 : index
    %c6 = arith.constant 6 : index
    %c16_13 = arith.constant 16 : index
    %16 = vector.load %arg1[%c0_12, %c6, %c16_13] : memref<1x30x64xbf16, #tpu.memory_space<vmem>>, vector<1x20x16xbf16>
    %17 = vector.shape_cast %16 : vector<1x20x16xbf16> to vector<20x16xbf16>
    %c128 = arith.constant 128 : index
    %c0_14 = arith.constant 0 : index
    %18 = vector.load %arg2[%c128, %c0_14] : memref<144x32xbf16, #tpu.memory_space<vmem>>, vector<16x32xbf16>
    %cst_15 = arith.constant dense<0.000000e+00> : vector<20x32xf32>
    %19 = tpu.matmul %17, %18, %cst_15 {dimension_numbers = #tpu.dot_dimension_numbers<[1], [0], [0], [1], [0, 0, 1, 1], [], []>} : vector<20x16xbf16>, vector<16x32xbf16>, vector<20x32xf32> -> vector<20x32xf32>
    %20 = arith.addf %15, %19 : vector<20x32xf32>
    %c0_16 = arith.constant 0 : index
    %c0_17 = arith.constant 0 : index
    %21 = vector.load %arg3[%c0_16, %c0_17] : memref<1x32xf32, #tpu.memory_space<vmem>>, vector<1x32xf32>
    %22 = vector.broadcast %21 : vector<1x32xf32> to vector<20x32xf32>
    %23 = arith.addf %20, %22 : vector<20x32xf32>
    %cst_18 = arith.constant 0.000000e+00 : f32
    %24 = vector.broadcast %cst_18 : f32 to vector<20x32xf32>
    %25 = arith.maximumf %23, %24 : vector<20x32xf32>
    %26 = arith.truncf %25 : vector<20x32xf32> to vector<20x32xbf16>
    %c0_19 = arith.constant 0 : index
    %c0_20 = arith.constant 0 : index
    %c0_21 = arith.constant 0 : index
    %27 = vector.load %arg4[%c0_19, %c0_20, %c0_21] : memref<1x20x32xbf16, #tpu.memory_space<vmem>>, vector<1x20x32xbf16>
    %28 = vector.shape_cast %27 : vector<1x20x32xbf16> to vector<20x32xbf16>
    %29 = vector.shape_cast %26 : vector<20x32xbf16> to vector<1x20x32xbf16>
    tpu.vector_store %arg4[%c0_19, %c0_20, %c0_21], %29 {strides = array<i32>} : memref<1x20x32xbf16, #tpu.memory_space<vmem>>, vector<1x20x32xbf16>,
    return
  }
  func.func @transform_0(%arg0: i32) -> (i32, i32, i32) {
    %c0_i32 = arith.constant 0 : i32
    %c0_i32_0 = arith.constant 0 : i32
    %c0_i32_1 = arith.constant 0 : i32
    return %arg0, %c0_i32, %c0_i32_0 : i32, i32, i32
  }
  func.func @transform_1(%arg0: i32) -> (i32, i32) {
    %c0_i32 = arith.constant 0 : i32
    %c0_i32_0 = arith.constant 0 : i32
    %c0_i32_1 = arith.constant 0 : i32
    return %c0_i32, %c0_i32_0 : i32, i32
  }
  func.func @transform_2(%arg0: i32) -> (i32, i32) {
    %c0_i32 = arith.constant 0 : i32
    %c0_i32_0 = arith.constant 0 : i32
    %c0_i32_1 = arith.constant 0 : i32
    return %c0_i32, %c0_i32_0 : i32, i32
  }
  func.func @transform_3(%arg0: i32) -> (i32, i32, i32) {
    %c0_i32 = arith.constant 0 : i32
    %c0_i32_0 = arith.constant 0 : i32
    %c0_i32_1 = arith.constant 0 : i32
    return %arg0, %c0_i32, %c0_i32_0 : i32, i32, i32
  }
}

module attributes {stable_mosaic.version = 11 : i64} {
  func.func @_conv_tile_kernel(%arg0: i32, %arg1: memref<1x12x128xbf16, #tpu.memory_space<vmem>>, %arg2: memref<288x64xbf16, #tpu.memory_space<vmem>>, %arg3: memref<1x64xf32, #tpu.memory_space<vmem>>, %arg4: memref<1x6x64xbf16, #tpu.memory_space<vmem>>) attributes {dimension_semantics = [#tpu.dimension_semantics<parallel>], iteration_bounds = array<i64: 2>, scalar_prefetch = 0 : i64, scratch_operands = 0 : i64, tpu.core_type = #tpu.core_type<tc>, window_params = [{transform_indices = @transform_0, window_bounds = array<i64: 1, 12, 128>}, {pipeline_mode = #tpu.pipeline_mode<synchronous>, transform_indices = @transform_1, window_bounds = array<i64: 288, 64>}, {pipeline_mode = #tpu.pipeline_mode<synchronous>, transform_indices = @transform_2, window_bounds = array<i64: 1, 64>}, {transform_indices = @transform_3, window_bounds = array<i64: 1, 6, 64>}]} {
    %cst = arith.constant 0.000000e+00 : f32
    %0 = vector.broadcast %cst : f32 to vector<6x64xf32>
    %c0 = arith.constant 0 : index
    %c0_0 = arith.constant 0 : index
    %c0_1 = arith.constant 0 : index
    %1 = vector.load %arg1[%c0, %c0_0, %c0_1] : memref<1x12x128xbf16, #tpu.memory_space<vmem>>, vector<1x6x128xbf16>
    %2 = vector.shape_cast %1 : vector<1x6x128xbf16> to vector<6x128xbf16>
    %c0_2 = arith.constant 0 : index
    %c0_3 = arith.constant 0 : index
    %3 = vector.load %arg2[%c0_2, %c0_3] : memref<288x64xbf16, #tpu.memory_space<vmem>>, vector<128x64xbf16>
    %cst_4 = arith.constant dense<0.000000e+00> : vector<6x64xf32>
    %4 = tpu.matmul %2, %3, %cst_4 {dimension_numbers = #tpu.dot_dimension_numbers<[1], [0], [0], [1], [0, 0, 1, 1], [], []>} : vector<6x128xbf16>, vector<128x64xbf16>, vector<6x64xf32> -> vector<6x64xf32>
    %5 = arith.addf %0, %4 : vector<6x64xf32>
    %c0_5 = arith.constant 0 : index
    %c1 = arith.constant 1 : index
    %c0_6 = arith.constant 0 : index
    %6 = vector.load %arg1[%c0_5, %c1, %c0_6] : memref<1x12x128xbf16, #tpu.memory_space<vmem>>, vector<1x6x64xbf16>
    %7 = vector.shape_cast %6 : vector<1x6x64xbf16> to vector<6x64xbf16>
    %c128 = arith.constant 128 : index
    %c0_7 = arith.constant 0 : index
    %8 = vector.load %arg2[%c128, %c0_7] : memref<288x64xbf16, #tpu.memory_space<vmem>>, vector<64x64xbf16>
    %cst_8 = arith.constant dense<0.000000e+00> : vector<6x64xf32>
    %9 = tpu.matmul %7, %8, %cst_8 {dimension_numbers = #tpu.dot_dimension_numbers<[1], [0], [0], [1], [0, 0, 1, 1], [], []>} : vector<6x64xbf16>, vector<64x64xbf16>, vector<6x64xf32> -> vector<6x64xf32>
    %10 = arith.addf %5, %9 : vector<6x64xf32>
    %c0_9 = arith.constant 0 : index
    %c3 = arith.constant 3 : index
    %c32 = arith.constant 32 : index
    %11 = vector.load %arg1[%c0_9, %c3, %c32] : memref<1x12x128xbf16, #tpu.memory_space<vmem>>, vector<1x6x64xbf16>
    %12 = vector.shape_cast %11 : vector<1x6x64xbf16> to vector<6x64xbf16>
    %c192 = arith.constant 192 : index
    %c0_10 = arith.constant 0 : index
    %13 = vector.load %arg2[%c192, %c0_10] : memref<288x64xbf16, #tpu.memory_space<vmem>>, vector<64x64xbf16>
    %cst_11 = arith.constant dense<0.000000e+00> : vector<6x64xf32>
    %14 = tpu.matmul %12, %13, %cst_11 {dimension_numbers = #tpu.dot_dimension_numbers<[1], [0], [0], [1], [0, 0, 1, 1], [], []>} : vector<6x64xbf16>, vector<64x64xbf16>, vector<6x64xf32> -> vector<6x64xf32>
    %15 = arith.addf %10, %14 : vector<6x64xf32>
    %c0_12 = arith.constant 0 : index
    %c4 = arith.constant 4 : index
    %c32_13 = arith.constant 32 : index
    %16 = vector.load %arg1[%c0_12, %c4, %c32_13] : memref<1x12x128xbf16, #tpu.memory_space<vmem>>, vector<1x6x32xbf16>
    %17 = vector.shape_cast %16 : vector<1x6x32xbf16> to vector<6x32xbf16>
    %c256 = arith.constant 256 : index
    %c0_14 = arith.constant 0 : index
    %18 = vector.load %arg2[%c256, %c0_14] : memref<288x64xbf16, #tpu.memory_space<vmem>>, vector<32x64xbf16>
    %cst_15 = arith.constant dense<0.000000e+00> : vector<6x64xf32>
    %19 = tpu.matmul %17, %18, %cst_15 {dimension_numbers = #tpu.dot_dimension_numbers<[1], [0], [0], [1], [0, 0, 1, 1], [], []>} : vector<6x32xbf16>, vector<32x64xbf16>, vector<6x64xf32> -> vector<6x64xf32>
    %20 = arith.addf %15, %19 : vector<6x64xf32>
    %c0_16 = arith.constant 0 : index
    %c0_17 = arith.constant 0 : index
    %21 = vector.load %arg3[%c0_16, %c0_17] : memref<1x64xf32, #tpu.memory_space<vmem>>, vector<1x64xf32>
    %22 = vector.broadcast %21 : vector<1x64xf32> to vector<6x64xf32>
    %23 = arith.addf %20, %22 : vector<6x64xf32>
    %cst_18 = arith.constant 0.000000e+00 : f32
    %24 = vector.broadcast %cst_18 : f32 to vector<6x64xf32>
    %25 = arith.maximumf %23, %24 : vector<6x64xf32>
    %26 = arith.truncf %25 : vector<6x64xf32> to vector<6x64xbf16>
    %c0_19 = arith.constant 0 : index
    %c0_20 = arith.constant 0 : index
    %c0_21 = arith.constant 0 : index
    %27 = vector.load %arg4[%c0_19, %c0_20, %c0_21] : memref<1x6x64xbf16, #tpu.memory_space<vmem>>, vector<1x6x64xbf16>
    %28 = vector.shape_cast %27 : vector<1x6x64xbf16> to vector<6x64xbf16>
    %29 = vector.shape_cast %26 : vector<6x64xbf16> to vector<1x6x64xbf16>
    tpu.vector_store %arg4[%c0_19, %c0_20, %c0_21], %29 {strides = array<i32>} : memref<1x6x64xbf16, #tpu.memory_space<vmem>>, vector<1x6x64xbf16>,
    return
  }
  func.func @transform_0(%arg0: i32) -> (i32, i32, i32) {
    %c0_i32 = arith.constant 0 : i32
    %c0_i32_0 = arith.constant 0 : i32
    %c0_i32_1 = arith.constant 0 : i32
    return %arg0, %c0_i32, %c0_i32_0 : i32, i32, i32
  }
  func.func @transform_1(%arg0: i32) -> (i32, i32) {
    %c0_i32 = arith.constant 0 : i32
    %c0_i32_0 = arith.constant 0 : i32
    %c0_i32_1 = arith.constant 0 : i32
    return %c0_i32, %c0_i32_0 : i32, i32
  }
  func.func @transform_2(%arg0: i32) -> (i32, i32) {
    %c0_i32 = arith.constant 0 : i32
    %c0_i32_0 = arith.constant 0 : i32
    %c0_i32_1 = arith.constant 0 : i32
    return %c0_i32, %c0_i32_0 : i32, i32
  }
  func.func @transform_3(%arg0: i32) -> (i32, i32, i32) {
    %c0_i32 = arith.constant 0 : i32
    %c0_i32_0 = arith.constant 0 : i32
    %c0_i32_1 = arith.constant 0 : i32
    return %arg0, %c0_i32, %c0_i32_0 : i32, i32, i32
  }
}

module attributes {stable_mosaic.version = 11 : i64} {
  func.func @_conv_tile_kernel(%arg0: i32, %arg1: memref<1x6x256xbf16, #tpu.memory_space<vmem>>, %arg2: memref<576x128xbf16, #tpu.memory_space<vmem>>, %arg3: memref<1x128xf32, #tpu.memory_space<vmem>>, %arg4: memref<1x2x128xbf16, #tpu.memory_space<vmem>>) attributes {dimension_semantics = [#tpu.dimension_semantics<parallel>], iteration_bounds = array<i64: 2>, scalar_prefetch = 0 : i64, scratch_operands = 0 : i64, tpu.core_type = #tpu.core_type<tc>, window_params = [{transform_indices = @transform_0, window_bounds = array<i64: 1, 6, 256>}, {pipeline_mode = #tpu.pipeline_mode<synchronous>, transform_indices = @transform_1, window_bounds = array<i64: 576, 128>}, {pipeline_mode = #tpu.pipeline_mode<synchronous>, transform_indices = @transform_2, window_bounds = array<i64: 1, 128>}, {transform_indices = @transform_3, window_bounds = array<i64: 1, 2, 128>}]} {
    %cst = arith.constant 0.000000e+00 : f32
    %0 = vector.broadcast %cst : f32 to vector<2x128xf32>
    %c0 = arith.constant 0 : index
    %c0_0 = arith.constant 0 : index
    %c0_1 = arith.constant 0 : index
    %1 = vector.load %arg1[%c0, %c0_0, %c0_1] : memref<1x6x256xbf16, #tpu.memory_space<vmem>>, vector<1x2x256xbf16>
    %2 = vector.shape_cast %1 : vector<1x2x256xbf16> to vector<2x256xbf16>
    %c0_2 = arith.constant 0 : index
    %c0_3 = arith.constant 0 : index
    %3 = vector.load %arg2[%c0_2, %c0_3] : memref<576x128xbf16, #tpu.memory_space<vmem>>, vector<256x128xbf16>
    %cst_4 = arith.constant dense<0.000000e+00> : vector<2x128xf32>
    %4 = tpu.matmul %2, %3, %cst_4 {dimension_numbers = #tpu.dot_dimension_numbers<[1], [0], [0], [1], [0, 0, 1, 1], [], []>} : vector<2x256xbf16>, vector<256x128xbf16>, vector<2x128xf32> -> vector<2x128xf32>
    %5 = arith.addf %0, %4 : vector<2x128xf32>
    %c0_5 = arith.constant 0 : index
    %c1 = arith.constant 1 : index
    %c0_6 = arith.constant 0 : index
    %6 = vector.load %arg1[%c0_5, %c1, %c0_6] : memref<1x6x256xbf16, #tpu.memory_space<vmem>>, vector<1x2x128xbf16>
    %7 = vector.shape_cast %6 : vector<1x2x128xbf16> to vector<2x128xbf16>
    %c256 = arith.constant 256 : index
    %c0_7 = arith.constant 0 : index
    %8 = vector.load %arg2[%c256, %c0_7] : memref<576x128xbf16, #tpu.memory_space<vmem>>, vector<128x128xbf16>
    %cst_8 = arith.constant dense<0.000000e+00> : vector<2x128xf32>
    %9 = tpu.matmul %7, %8, %cst_8 {dimension_numbers = #tpu.dot_dimension_numbers<[1], [0], [0], [1], [0, 0, 1, 1], [], []>} : vector<2x128xbf16>, vector<128x128xbf16>, vector<2x128xf32> -> vector<2x128xf32>
    %10 = arith.addf %5, %9 : vector<2x128xf32>
    %c0_9 = arith.constant 0 : index
    %c2 = arith.constant 2 : index
    %c64 = arith.constant 64 : index
    %11 = vector.load %arg1[%c0_9, %c2, %c64] : memref<1x6x256xbf16, #tpu.memory_space<vmem>>, vector<1x2x128xbf16>
    %12 = vector.shape_cast %11 : vector<1x2x128xbf16> to vector<2x128xbf16>
    %c384 = arith.constant 384 : index
    %c0_10 = arith.constant 0 : index
    %13 = vector.load %arg2[%c384, %c0_10] : memref<576x128xbf16, #tpu.memory_space<vmem>>, vector<128x128xbf16>
    %cst_11 = arith.constant dense<0.000000e+00> : vector<2x128xf32>
    %14 = tpu.matmul %12, %13, %cst_11 {dimension_numbers = #tpu.dot_dimension_numbers<[1], [0], [0], [1], [0, 0, 1, 1], [], []>} : vector<2x128xbf16>, vector<128x128xbf16>, vector<2x128xf32> -> vector<2x128xf32>
    %15 = arith.addf %10, %14 : vector<2x128xf32>
    %c0_12 = arith.constant 0 : index
    %c3 = arith.constant 3 : index
    %c64_13 = arith.constant 64 : index
    %16 = vector.load %arg1[%c0_12, %c3, %c64_13] : memref<1x6x256xbf16, #tpu.memory_space<vmem>>, vector<1x2x64xbf16>
    %17 = vector.shape_cast %16 : vector<1x2x64xbf16> to vector<2x64xbf16>
    %c512 = arith.constant 512 : index
    %c0_14 = arith.constant 0 : index
    %18 = vector.load %arg2[%c512, %c0_14] : memref<576x128xbf16, #tpu.memory_space<vmem>>, vector<64x128xbf16>
    %cst_15 = arith.constant dense<0.000000e+00> : vector<2x128xf32>
    %19 = tpu.matmul %17, %18, %cst_15 {dimension_numbers = #tpu.dot_dimension_numbers<[1], [0], [0], [1], [0, 0, 1, 1], [], []>} : vector<2x64xbf16>, vector<64x128xbf16>, vector<2x128xf32> -> vector<2x128xf32>
    %20 = arith.addf %15, %19 : vector<2x128xf32>
    %c0_16 = arith.constant 0 : index
    %c0_17 = arith.constant 0 : index
    %21 = vector.load %arg3[%c0_16, %c0_17] : memref<1x128xf32, #tpu.memory_space<vmem>>, vector<1x128xf32>
    %22 = vector.broadcast %21 : vector<1x128xf32> to vector<2x128xf32>
    %23 = arith.addf %20, %22 : vector<2x128xf32>
    %cst_18 = arith.constant 0.000000e+00 : f32
    %24 = vector.broadcast %cst_18 : f32 to vector<2x128xf32>
    %25 = arith.maximumf %23, %24 : vector<2x128xf32>
    %26 = arith.truncf %25 : vector<2x128xf32> to vector<2x128xbf16>
    %c0_19 = arith.constant 0 : index
    %c0_20 = arith.constant 0 : index
    %c0_21 = arith.constant 0 : index
    %27 = vector.load %arg4[%c0_19, %c0_20, %c0_21] : memref<1x2x128xbf16, #tpu.memory_space<vmem>>, vector<1x2x128xbf16>
    %28 = vector.shape_cast %27 : vector<1x2x128xbf16> to vector<2x128xbf16>
    %29 = vector.shape_cast %26 : vector<2x128xbf16> to vector<1x2x128xbf16>
    tpu.vector_store %arg4[%c0_19, %c0_20, %c0_21], %29 {strides = array<i32>} : memref<1x2x128xbf16, #tpu.memory_space<vmem>>, vector<1x2x128xbf16>,
    return
  }
  func.func @transform_0(%arg0: i32) -> (i32, i32, i32) {
    %c0_i32 = arith.constant 0 : i32
    %c0_i32_0 = arith.constant 0 : i32
    %c0_i32_1 = arith.constant 0 : i32
    return %arg0, %c0_i32, %c0_i32_0 : i32, i32, i32
  }
  func.func @transform_1(%arg0: i32) -> (i32, i32) {
    %c0_i32 = arith.constant 0 : i32
    %c0_i32_0 = arith.constant 0 : i32
    %c0_i32_1 = arith.constant 0 : i32
    return %c0_i32, %c0_i32_0 : i32, i32
  }
  func.func @transform_2(%arg0: i32) -> (i32, i32) {
    %c0_i32 = arith.constant 0 : i32
    %c0_i32_0 = arith.constant 0 : i32
    %c0_i32_1 = arith.constant 0 : i32
    return %c0_i32, %c0_i32_0 : i32, i32
  }
  func.func @transform_3(%arg0: i32) -> (i32, i32, i32) {
    %c0_i32 = arith.constant 0 : i32
    %c0_i32_0 = arith.constant 0 : i32
    %c0_i32_1 = arith.constant 0 : i32
    return %arg0, %c0_i32, %c0_i32_0 : i32, i32, i32
  }
}

</mosaic_0001>

<bundles_post_ra>
// kernel: forward.5
= control target key start
LH: loop header
LB: loop body
LE: loop exit
PB: predicated region body
PF: predicated region fallthrough
CT: control target
= control target key end

     0   :  { %s1616_s12 = smov 0   ;;  %s1981_s0 = inlined_call_operand.vmem [shape: bf16[4,170,16], index: 0, kind: input, shape index: {}]   ;;  %s1982_s1 = inlined_call_operand.vmem [shape: bf16[36,8], index: 1, kind: input, shape index: {}]   ;;  %s1983_s2 = inlined_call_operand.vmem [shape: f32[1,8], index: 2, kind: input, shape index: {}]   ;;  %s1984_s3 = inlined_call_operand.vmem [shape: bf16[4,136,8], index: 3, kind: output, shape index: {}]  }
   0x1 LB: > { %s1258_s13 = sadd.s32 4294967295, %s1591_s12   ;;  %p1262_p0 = scmp.ge.s32.totalorder %s1591_s12, 1  ;;  %s1591_s12 = sphi %s1616_s12, %s13_s12  }
   0x2   : > { %p137_p1 = scmp.lt.s32.totalorder %s1591_s12, 5 }
   0x4   : > { %p138_p2 = pnand %p1262_p0, %p137_p1 }
   0x5   : > { %p161_p3 = scmp.lt.s32.totalorder (!%p138_p2), %s1258_s13, 3  ;;  %s1595_s24 = smov (!%p138_p2), 124  }
   0x6   : > { %141 = sbr.rel (%p138_p2) target bundleno = 410 (0x19a), region = 32 }
   0xb   : > { %v1593_v0 = vmov 0.0   ;;  %v192_v1 = vld [vmem:[%s1982_s1 + $0x8] sm:$0xf]  ;;  %vm338_vm0 = vcmask 1043456   ;;  %s1986_s13 = smov (!%p161_p3, %s1258_s13), 3  ;;  %vm1594_vm1 = vmmov 0  }
   0xc   : > { %1399 = vmatprep.subr.bf16.mxu0 %v1593_v0  ;;  %1437 = vmatprep.subr.bf16.mxu1 %v1593_v0  ;;  %v340_v2 = vsel %vm338_vm0, %v192_v1, 0  ;;  %v1571_v3 = vld [vmem:[%s1982_s1] sm:$0xff]   ;;  %s1551_s18 = smul.u32 88, %s1986_s13  ;;  %vm238_vm2 = vsmask.f32 7424  ;;  %vm886_vm3 = vcmask 1046528  }
   0xd   : > { %1401 = vmatprep.mubr.msk.bf16.mxu0 %vm1594_vm1, %v1593_v0  ;;  %1439 = vmatprep.mubr.msk.bf16.mxu1 %vm1594_vm1, %v1593_v0  ;;  %vm453_vm4 = vcmask 130048   ;;  %v882_v14 = vld [vmem:[%s1982_s1 + $0x10] sm:$0x3]  ;;  %vm950_vm5 = vcmask 1041408   ;;  %vm310_vm6 = vcmask 64512   ;;  %vm922_vm7 = vcmask 31744  }
   0xe   : > { %1400 = vmatpush3.bf16.msra.mxu0 %v340_v2  ;;  %1438 = vmatpush3.bf16.msra.mxu1 %v1571_v3  ;;  %s1645_s21 = scalar_lea.vmem %s1981_s0, %s1551_s18  ;;  %v952_v31 = vsel %vm950_vm5, %v882_v14, 0  ;;  %v595_v42 = vld [vmem:[%s1982_s1 + $0xc] sm:$0xf]  ;;  %s1552_s29 = smul.u32 68, %s1986_s13  ;;  %vm1185_vm8 = vcmask 60416  }
   0xf   : > { %1475 = vmatprep.subr.bf16.mxu0 %v1593_v0  ;;  %1513 = vmatprep.subr.bf16.mxu1 %v1593_v0  ;;  %v577_v4 = vld [vmem:[%s1645_s21 + $0x8] sm:$0xf]  ;;  %v578_v5 = vld [vmem:[%s1645_s21 + $0xc] sm:$0xf]  ;;  %v1565_v7 = vld [vmem:[%s1645_s21 + $0x10] sm:$0xff]   ;;  %v758_v60 = vsel %vm338_vm0, %v595_v42, 0 }
  0x10   : > { %v1294_v6 = vcombine.low %v577_v4, %v578_v5  ;;  %v881_v8 = vld [vmem:[%s1645_s21 + $0x8] sm:$0xe]  ;;  %v1567_v10 = vld [vmem:[%s1645_s21 + $0x18] sm:$0xff]   ;;  %v649_v13 = vshll.u32 %v1565_v7, 16  ;;  %v888_v16 = vrot.slane %v1565_v7, 1  ;;  %v653_v17 = vshrl.u32 %v1565_v7, 16  ;;  %s1911_s5 = scalar_lea.vmem %s1984_s3, %s1552_s29 }
  0x11   : > { %v1312_v9 = vcombine.low %v881_v8, %v578_v5  ;;  %v657_v18 = vshll.u32 %v1567_v10, 16  ;;  %v890_v21 = vrot.slane %v1567_v10, 1  ;;  %v1568_v22 = vld [vmem:[%s1645_s21 + $0x20] sm:$0xff]   ;;  %v1657_v24 = vld [vmem:[%s1645_s21 + $0x28] sm:$0xff]   ;;  %v661_v27 = vshrl.u32 %v1567_v10, 16  ;;  %v1670_v37 = vld [vmem:[%s1645_s21 + $0x30] sm:$0xff]  }
  0x12   : > { %v642_v11 = vshrl.u32 %v1294_v6, 16  ;;  %v644_v12 = vshll.u32 %v1294_v6, 16  ;;  %v651_v20 = vrot.slane %v649_v13, 1  ;;  %v665_v28 = vshll.u32 %v1568_v22, 16  ;;  %v1572_v29 = vld [vmem:[%s1645_s21] sm:$0xff]   ;;  %v1573_v30 = vld [vmem:[%s1645_s21 + $0x8] sm:$0xff]  }
  0x13   : > { %v887_v15 = vrot.slane %v1312_v9, 1  ;;  %v659_v23 = vrot.slane %v657_v18, 1  ;;  %1440 = vmatmul.mubr.msk.bf16.vlgmr.msra.gmra.mxu1 %vm453_vm4, %v1572_v29  ;;  %v892_v35 = vrot.slane %v1568_v22, 1  ;;  %v673_v36 = vshll.u32 %v1657_v24, 16  ;;  %v1679_v46 = vld [vmem:[%s1645_s21 + $0x10] sm:$0xff]   ;;  %v1683_v48 = vld [vmem:[%s1645_s21 + $0x38] sm:$0xff]  }
  0x14   : > { %v646_v19 = vrot.slane %v644_v12, 1  ;;  %v655_v26 = vor.u32 %v653_v17, %v651_v20  ;;  %v891_v38 = vsel %vm886_vm3, %v888_v16, %v890_v21  ;;  %v667_v40 = vrot.slane %v665_v28, 1  ;;  %1514 = vmatpush3.bf16.msra.mxu1 %v952_v31  ;;  %1443 = vmatprep.mubr.msk.bf16.mxu1 %vm1594_vm1, %v1593_v0  ;;  %v1696_v63 = vld [vmem:[%s1645_s21 + $0x40] sm:$0xff]   ;;  %v1577_v9 = vld [vmem:[%s1645_s21 + $0x18] sm:$0xff]   ;;  %v1578_v18 = vld [vmem:[%s1645_s21 + $0x48] sm:$0x1f]  }
  0x15   : > { %v889_v34 = vsel %vm886_vm3, %v887_v15, %v888_v16  ;;  %v663_v39 = vor.u32 %v661_v27, %v659_v23  ;;  %v669_v41 = vshrl.u32 %v1568_v22, 16  ;;  %v240_v43 = vshrl.u32 %v1572_v29, 16  ;;  %v1717_v15 = vld [vmem:[%s1645_s21 + $0x38] sm:$0xff]  }
  0x16   : > { %v647_v25 = vor.u32 %v646_v19, %v642_v11  ;;  %v660_v33 = vsel %vm238_vm2, %v655_v26, %v659_v23  ;;  %v242_v44 = vshll.u32 %v1572_v29, 16  ;;  %v247_v45 = vshll.u32 %v1573_v30, 16  ;;  %v1723_v19 = vld [vmem:[%s1645_s21 + $0x40] sm:$0xf]  ;;  %v191_v23 = vld [vmem:[%s1645_s21 + $0x44] sm:$0x1] }
  0x17   : > { %714 = vrot.lane.b32.xlu1 %v660_v33, %s1595_s24  ;;  %v894_v47 = vrot.slane %v1657_v24, 1  ;;  %v893_v49 = vsel %vm886_vm3, %v890_v21, %v892_v35  ;;  %v675_v50 = vrot.slane %v673_v36, 1  ;;  %v668_v53 = vsel %vm238_vm2, %v663_v39, %v667_v40  ;;  %v1579_v36 = vld [vmem:[%s1645_s21 + $0x20] sm:$0xff]  }
  0x18   : > { %v652_v32 = vsel %vm238_vm2, %v647_v25, %v651_v20  ;;  %v244_v51 = vrot.slane %v242_v44, 1  ;;  %v249_v52 = vrot.slane %v247_v45, 1  ;;  %v671_v54 = vor.u32 %v669_v41, %v667_v40 }
  0x19   : > { %712 = vrot.lane.b32.xlu0 %v652_v32, %s1595_s24  ;;  %v677_v55 = vshrl.u32 %v1657_v24, 16  ;;  %v681_v56 = vshll.u32 %v1670_v37, 16  ;;  %v251_v58 = vshrl.u32 %v1573_v30, 16  ;;  %v255_v59 = vshll.u32 %v1679_v46, 16 }
  0x1a   : > { %v245_v57 = vor.u32 %v244_v51, %v240_v43  ;;  %v685_v61 = vshrl.u32 %v1670_v37, 16  ;;  %v689_v62 = vshll.u32 %v1683_v48, 16  ;;  %v895_v1 = vsel %vm886_vm3, %v892_v35, %v894_v47 }
  0x1b   : > { %906 = vrot.lane.b32.xlu1 %v891_v38, %s1595_s24  ;;  %1444 = vmatmul.mubr.msk.bf16.gmra.mxu1 %vm453_vm4, %v1573_v30  ;;  %v676_v3 = vsel %vm238_vm2, %v671_v54, %v675_v50  ;;  %v679_v4 = vor.u32 %v677_v55, %v675_v50  ;;  %v683_v5 = vrot.slane %v681_v56, 1  ;;  %v896_v6 = vrot.slane %v1670_v37, 1  ;;  %v1580_v55 = vld [vmem:[%s1645_s21 + $0x28] sm:$0xff]  }
  0x1c   : > { %v250_v2 = vsel %vm238_vm2, %v245_v57, %v249_v52  ;;  %1447 = vmatprep.mubr.msk.bf16.mxu1 %vm1594_vm1, %v1593_v0  ;;  %v253_v7 = vor.u32 %v251_v58, %v249_v52  ;;  %v257_v8 = vrot.slane %v255_v59, 1  ;;  %v691_v11 = vrot.slane %v689_v62, 1  ;;  %v1581_v62 = vld [vmem:[%s1645_s21 + $0x30] sm:$0xff]  }
  0x1d   : > { %904 = vrot.lane.b32.xlu0 %v889_v34, %s1595_s24  ;;  %1402 = vmatmul.mubr.msk.bf16.vlgmr.msra.gmra.mxu0 %vm310_vm6, %v250_v2  ;;  %v687_v10 = vor.u32 %v685_v61, %v683_v5  ;;  %v898_v12 = vrot.slane %v1683_v48, 1  ;;  %v693_v13 = vshrl.u32 %v1683_v48, 16  ;;  %v697_v14 = vshll.u32 %v1696_v63, 16 }
  0x1e   : > { %1476 = vmatpush3.bf16.msra.mxu0 %v758_v60  ;;  %1405 = vmatprep.mubr.msk.bf16.mxu0 %vm1594_vm1, %v1593_v0  ;;  %v684_v16 = vsel %vm238_vm2, %v679_v4, %v683_v5  ;;  %v897_v17 = vsel %vm886_vm3, %v894_v47, %v896_v6  ;;  %v258_v20 = vsel %vm238_vm2, %v253_v7, %v257_v8  ;;  %v259_v21 = vshrl.u32 %v1679_v46, 16 }
  0x1f   : > { %908 = vrot.lane.b32.xlu1 %v893_v49, %s1595_s24  ;;  %v263_v22 = vshll.u32 %v1577_v9, 16  ;;  %v692_v24 = vsel %vm238_vm2, %v687_v10, %v691_v11  ;;  %v899_v25 = vsel %vm886_vm3, %v896_v6, %v898_v12  ;;  %v900_v26 = vrot.slane %v1696_v63, 1 }
  0x20   : > { %v295_v27 = vshll.u32 %v1717_v15, 16  ;;  %v1737_v28 = vcombine.low %v1723_v19, %v191_v23  ;;  %v299_v29 = vshrl.u32 %v1717_v15, 16  ;;  %v695_v30 = vor.u32 %v693_v13, %v691_v11 }
  0x21   : > { %716 = vrot.lane.b32.xlu0 %v668_v53, %s1595_s24  ;;  %v699_v31 = vrot.slane %v697_v14, 1  ;;  %v701_v32 = vshrl.u32 %v1696_v63, 16  ;;  %v705_v33 = vshll.u32 %v1578_v18, 16  ;;  %v261_v34 = vor.u32 %v259_v21, %v257_v8 }
  0x22   : > { %v265_v35 = vrot.slane %v263_v22, 1  ;;  %v297_v37 = vrot.slane %v295_v27, 1  ;;  %v303_v38 = vshll.u32 %v1737_v28, 16  ;;  %v901_v39 = vsel %vm886_vm3, %v898_v12, %v900_v26 }
  0x23   : > { %910 = vrot.lane.b32.xlu1 %v895_v1, %s1595_s24  ;;  %1448 = vmatmul.mubr.msk.bf16.gmra.mxu1 %vm453_vm4, %v1679_v46  ;;  %v700_v42 = vsel %vm238_vm2, %v695_v30, %v699_v31  ;;  %v703_v43 = vor.u32 %v701_v32, %v699_v31  ;;  %v707_v44 = vrot.slane %v705_v33, 1  ;;  %v902_v45 = vrot.slane %v1578_v18, 1 }
  0x24   : > { %1451 = vmatprep.mubr.msk.bf16.mxu1 %vm1594_vm1, %v1593_v0  ;;  %v301_v40 = vor.u32 %v299_v29, %v297_v37  ;;  %v1751_v41 = vrot.slane %v303_v38, 1  ;;  %v266_v46 = vsel %vm238_vm2, %v261_v34, %v265_v35  ;;  %v267_v47 = vshrl.u32 %v1577_v9, 16 }
  0x25   : > { %718 = vrot.lane.b32.xlu0 %v676_v3, %s1595_s24  ;;  %1406 = vmatmul.mubr.msk.bf16.gmra.mxu0 %vm310_vm6, %v258_v20  ;;  %v271_v48 = vshll.u32 %v1579_v36, 16  ;;  %v709_v50 = vshrl.u32 %v1578_v18, 16  ;;  %v708_v51 = vsel %vm238_vm2, %v703_v43, %v707_v44  ;;  %v903_v52 = vsel %vm886_vm3, %v900_v26, %v902_v45 }
  0x26   : > { %1409 = vmatprep.mubr.msk.bf16.mxu0 %vm1594_vm1, %v1593_v0  ;;  %v306_v49 = vsel %vm238_vm2, %v301_v40, %v1751_v41  ;;  %v269_v53 = vor.u32 %v267_v47, %v265_v35  ;;  %v275_v58 = vshrl.u32 %v1579_v36, 16  ;;  %v279_v59 = vshll.u32 %v1580_v55, 16 }
  0x27   : > { %912 = vrot.lane.b32.xlu1 %v897_v17, %s1595_s24  ;;  %v273_v54 = vrot.slane %v271_v48, 1  ;;  %v711_v56 = vor.u32 %v709_v50, %v707_v44  ;;  %v283_v1 = vshrl.u32 %v1580_v55, 16  ;;  %v287_v2 = vshll.u32 %v1581_v62, 16 }
  0x28   : > { %v281_v61 = vrot.slane %v279_v59, 1  ;;  %v291_v6 = vshrl.u32 %v1581_v62, 16  ;;  %v307_v10 = vshrl.u32 %v1737_v28, 16 }
  0x29   : > { %720 = vrot.lane.b32.xlu0 %v684_v16, %s1595_s24  ;;  %v274_v57 = vsel %vm238_vm2, %v269_v53, %v273_v54  ;;  %v277_v60 = vor.u32 %v275_v58, %v273_v54  ;;  %v289_v4 = vrot.slane %v287_v2, 1 }
  0x2a   : > { %v285_v3 = vor.u32 %v283_v1, %v281_v61  ;;  %v309_v11 = vor.u32 %v307_v10, %v1751_v41 }
  0x2b   : > { %914 = vrot.lane.b32.xlu1 %v899_v25, %s1595_s24  ;;  %1452 = vmatmul.mubr.msk.bf16.gmra.mxu1 %vm453_vm4, %v1577_v9  ;;  %v282_v63 = vsel %vm238_vm2, %v277_v60, %v281_v61  ;;  %v293_v7 = vor.u32 %v291_v6, %v289_v4  ;;  %v1283_v9 = vcombine.low %v1723_v19, %v1723_v19 }
  0x2c   : > { %1455 = vmatprep.mubr.msk.bf16.mxu1 %vm1594_vm1, %v1593_v0  ;;  %v290_v5 = vsel %vm238_vm2, %v285_v3, %v289_v4 }
  0x2d   : > { %722 = vrot.lane.b32.xlu0 %v692_v24, %s1595_s24  ;;  %1410 = vmatmul.mubr.msk.bf16.gmra.mxu0 %vm310_vm6, %v266_v46  ;;  %v298_v8 = vsel %vm238_vm2, %v293_v7, %v297_v37 }
  0x2e   : > { %1413 = vmatprep.mubr.msk.bf16.mxu0 %vm1594_vm1, %v1593_v0 }
  0x2f   : > { %916 = vrot.lane.b32.xlu1 %v901_v39, %s1595_s24 }
  0x31   : > { %724 = vrot.lane.b32.xlu0 %v700_v42, %s1595_s24 }
  0x33   : > { %918 = vrot.lane.b32.xlu1 %v903_v52, %s1595_s24  ;;  %1456 = vmatmul.mubr.msk.bf16.gmra.mxu1 %vm453_vm4, %v1579_v36 }
  0x34   : > { %1459 = vmatprep.mubr.msk.bf16.mxu1 %vm1594_vm1, %v1593_v0 }
  0x35   : > { %726 = vrot.lane.b32.xlu0 %v708_v51, %s1595_s24  ;;  %1414 = vmatmul.mubr.msk.bf16.gmra.mxu0 %vm310_vm6, %v274_v57 }
  0x36   : > { %1417 = vmatprep.mubr.msk.bf16.mxu0 %vm1594_vm1, %v1593_v0 }
  0x37   : > { %920 = vrot.lane.b32.xlu1 %v902_v45, %s1595_s24 }
  0x39   : > { %728 = vrot.lane.b32.xlu0 %v711_v56, %s1595_s24 }
  0x3b   : > { %1460 = vmatmul.mubr.msk.bf16.gmra.mxu1 %vm453_vm4, %v1580_v55 }
  0x3c   : > { %1463 = vmatprep.mubr.msk.bf16.mxu1 %vm1594_vm1, %v1593_v0 }
  0x3d   : > { %1418 = vmatmul.mubr.msk.bf16.gmra.mxu0 %vm310_vm6, %v282_v63 }
  0x3e   : > { %1421 = vmatprep.mubr.msk.bf16.mxu0 %vm1594_vm1, %v1593_v0 }
  0x43   : > { %1464 = vmatmul.mubr.msk.bf16.gmra.mxu1 %vm453_vm4, %v1581_v62 }
  0x44   : > { %1467 = vmatprep.mubr.msk.bf16.mxu1 %vm1594_vm1, %v1593_v0 }
  0x45   : > { %1422 = vmatmul.mubr.msk.bf16.gmra.mxu0 %vm310_vm6, %v290_v5 }
  0x46   : > { %1425 = vmatprep.mubr.msk.bf16.mxu0 %vm1594_vm1, %v1593_v0 }
  0x4b   : > { %1468 = vmatmul.mubr.msk.bf16.gmra.mxu1 %vm453_vm4, %v1717_v15 }
  0x4c   : > { %1471 = vmatprep.mubr.msk.bf16.mxu1 %vm1594_vm1, %v1593_v0 }
  0x4d   : > { %1426 = vmatmul.mubr.msk.bf16.gmra.mxu0 %vm310_vm6, %v298_v8 }
  0x4e   : > { %1429 = vmatprep.mubr.msk.bf16.mxu0 %vm1594_vm1, %v1593_v0 }
  0x53   : > { %1472 = vmatmul.mubr.msk.bf16.gmra.mxu1 %vm453_vm4, %v1283_v9 }
  0x54   : > { %1515 = vmatprep.mubr.msk.bf16.mxu1 %vm1594_vm1, %v1593_v0 }
  0x55   : > { %1430 = vmatmul.mubr.msk.bf16.gmra.mxu0 %vm310_vm6, %v306_v49 }
  0x56   : > { %1433 = vmatprep.mubr.msk.bf16.mxu0 %vm1594_vm1, %v1593_v0 }
  0x5d   : > { %1434 = vmatmul.mubr.msk.bf16.gmra.mxu0 %vm310_vm6, %v309_v11 }
  0x5e   : > { %1477 = vmatprep.mubr.msk.bf16.mxu0 %vm1594_vm1, %v1593_v0 }
  0x89   : > { %v715_v14 = vpop.permute.xlu1 %714 }
  0x8b   : > { %v713_v12 = vpop.permute.xlu0 %712 }
  0x8c   : > { %1478 = vmatmul.mubr.msk.bf16.vlgmr.msra.gmra.mxu0 %vm310_vm6, %v713_v12 }
  0x8d   : > { %1481 = vmatprep.mubr.msk.bf16.mxu0 %vm1594_vm1, %v1593_v0  ;;  %v907_v15 = vpop.permute.xlu1 %906 }
  0x8f   : > { %v905_v13 = vpop.permute.xlu0 %904 }
  0x90   : > { %1516 = vmatmul.mubr.msk.bf16.vlgmr.msra.gmra.mxu1 %vm922_vm7, %v905_v13 }
  0x91   : > { %1519 = vmatprep.mubr.msk.bf16.mxu1 %vm1594_vm1, %v1593_v0  ;;  %v909_v17 = vpop.permute.xlu1 %908 }
  0x93   : > { %v717_v16 = vpop.permute.xlu0 %716 }
  0x94   : > { %1482 = vmatmul.mubr.msk.bf16.gmra.mxu0 %vm310_vm6, %v715_v14 }
  0x95   : > { %1485 = vmatprep.mubr.msk.bf16.mxu0 %vm1594_vm1, %v1593_v0  ;;  %v911_v19 = vpop.permute.xlu1 %910 }
  0x97   : > { %v719_v18 = vpop.permute.xlu0 %718 }
  0x98   : > { %1520 = vmatmul.mubr.msk.bf16.gmra.mxu1 %vm922_vm7, %v907_v15 }
  0x99   : > { %1523 = vmatprep.mubr.msk.bf16.mxu1 %vm1594_vm1, %v1593_v0  ;;  %v913_v21 = vpop.permute.xlu1 %912 }
  0x9b   : > { %v721_v20 = vpop.permute.xlu0 %720 }
  0x9c   : > { %1486 = vmatmul.mubr.msk.bf16.gmra.mxu0 %vm310_vm6, %v717_v16 }
  0x9d   : > { %1489 = vmatprep.mubr.msk.bf16.mxu0 %vm1594_vm1, %v1593_v0  ;;  %v915_v23 = vpop.permute.xlu1 %914 }
  0x9f   : > { %v723_v22 = vpop.permute.xlu0 %722 }
  0xa0   : > { %1524 = vmatmul.mubr.msk.bf16.gmra.mxu1 %vm922_vm7, %v909_v17 }
  0xa1   : > { %1527 = vmatprep.mubr.msk.bf16.mxu1 %vm1594_vm1, %v1593_v0  ;;  %v917_v25 = vpop.permute.xlu1 %916 }
  0xa3   : > { %v725_v24 = vpop.permute.xlu0 %724 }
  0xa4   : > { %1490 = vmatmul.mubr.msk.bf16.gmra.mxu0 %vm310_vm6, %v719_v18 }
  0xa5   : > { %1493 = vmatprep.mubr.msk.bf16.mxu0 %vm1594_vm1, %v1593_v0  ;;  %v919_v27 = vpop.permute.xlu1 %918 }
  0xa7   : > { %v727_v26 = vpop.permute.xlu0 %726 }
  0xa8   : > { %1528 = vmatmul.mubr.msk.bf16.gmra.mxu1 %vm922_vm7, %v911_v19 }
  0xa9   : > { %1531 = vmatprep.mubr.msk.bf16.mxu1 %vm1594_vm1, %v1593_v0  ;;  %v921_v29 = vpop.permute.xlu1 %920 }
  0xab   : > { %v729_v28 = vpop.permute.xlu0 %728 }
  0xac   : > { %1494 = vmatmul.mubr.msk.bf16.gmra.mxu0 %vm310_vm6, %v721_v20 }
  0xad   : > { %1497 = vmatprep.mubr.msk.bf16.mxu0 %vm1594_vm1, %v1593_v0 }
  0xb0   : > { %1532 = vmatmul.mubr.msk.bf16.gmra.mxu1 %vm922_vm7, %v913_v21 }
  0xb1   : > { %1535 = vmatprep.mubr.msk.bf16.mxu1 %vm1594_vm1, %v1593_v0 }
  0xb4   : > { %1498 = vmatmul.mubr.msk.bf16.gmra.mxu0 %vm310_vm6, %v723_v22 }
  0xb5   : > { %1501 = vmatprep.mubr.msk.bf16.mxu0 %vm1594_vm1, %v1593_v0 }
  0xb8   : > { %1536 = vmatmul.mubr.msk.bf16.gmra.mxu1 %vm922_vm7, %v915_v23 }
  0xb9   : > { %1539 = vmatprep.mubr.msk.bf16.mxu1 %vm1594_vm1, %v1593_v0 }
  0xbc   : > { %1502 = vmatmul.mubr.msk.bf16.gmra.mxu0 %vm310_vm6, %v725_v24 }
  0xbd   : > { %1505 = vmatprep.mubr.msk.bf16.mxu0 %vm1594_vm1, %v1593_v0 }
  0xc0   : > { %1540 = vmatmul.mubr.msk.bf16.gmra.mxu1 %vm922_vm7, %v917_v25 }
  0xc1   : > { %1543 = vmatprep.mubr.msk.bf16.mxu1 %vm1594_vm1, %v1593_v0 }
  0xc4   : > { %1506 = vmatmul.mubr.msk.bf16.gmra.mxu0 %vm310_vm6, %v727_v26 }
  0xc5   : > { %1509 = vmatprep.mubr.msk.bf16.mxu0 %vm1594_vm1, %v1593_v0 }
  0xc8   : > { %1544 = vmatmul.mubr.msk.bf16.gmra.mxu1 %vm922_vm7, %v919_v27 }
  0xc9   : > { %1547 = vmatprep.mubr.msk.bf16.mxu1 %vm1594_vm1, %v1593_v0 }
  0xcc   : > { %1510 = vmatmul.mubr.msk.bf16.gmra.mxu0 %vm310_vm6, %v729_v28 }
  0xd0   : > { %1548 = vmatmul.mubr.msk.bf16.gmra.mxu1 %vm922_vm7, %v921_v29 }
  0xd3   : > { %v507_v30 = vpop.f32.mrf.mxu1 }
  0xd5   : > { %v1441_v31 = vpop.f32.mrf.mxu1 }
  0xd7   : > { %v510_v32 = vpop.f32.mrf.mxu1 }
  0xd9   : > { %v1442_v33 = vpop.f32.mrf.mxu1 }
  0xdb   : > { %v515_v34 = vpop.f32.mrf.mxu1 }
  0xdd   : > { %v376_v35 = vpop.f32.mrf.mxu0  ;;  %v1445_v36 = vpop.f32.mrf.mxu1 }
  0xde   : > { %v1865_v37 = vadd.f32 %v507_v30, %v376_v35 }
  0xdf   : > { %v1403_v38 = vpop.f32.mrf.mxu0  ;;  %v518_v39 = vpop.f32.mrf.mxu1 }
  0xe1   : > { %v379_v40 = vpop.f32.mrf.mxu0  ;;  %v1446_v41 = vpop.f32.mrf.mxu1 }
  0xe2   : > { %v1867_v42 = vadd.f32 %v510_v32, %v379_v40 }
  0xe3   : > { %v1404_v0 = vpop.f32.mrf.mxu0  ;;  %v523_v43 = vpop.f32.mrf.mxu1 }
  0xe5   : > { %v384_v44 = vpop.f32.mrf.mxu0  ;;  %v1449_v45 = vpop.f32.mrf.mxu1 }
  0xe6   : > { %v1869_v46 = vadd.f32 %v515_v34, %v384_v44 }
  0xe7   : > { %v1407_v47 = vpop.f32.mrf.mxu0  ;;  %v526_v48 = vpop.f32.mrf.mxu1 }
  0xe9   : > { %v387_v49 = vpop.f32.mrf.mxu0  ;;  %v1450_v50 = vpop.f32.mrf.mxu1 }
  0xea   : > { %v1871_v51 = vadd.f32 %v518_v39, %v387_v49 }
  0xeb   : > { %v1408_v52 = vpop.f32.mrf.mxu0  ;;  %v531_v53 = vpop.f32.mrf.mxu1 }
  0xed   : > { %v392_v54 = vpop.f32.mrf.mxu0  ;;  %v1453_v55 = vpop.f32.mrf.mxu1 }
  0xee   : > { %v1873_v56 = vadd.f32 %v523_v43, %v392_v54 }
  0xef   : > { %v1411_v57 = vpop.f32.mrf.mxu0  ;;  %v534_v58 = vpop.f32.mrf.mxu1 }
  0xf1   : > { %v395_v59 = vpop.f32.mrf.mxu0  ;;  %v1454_v60 = vpop.f32.mrf.mxu1 }
  0xf2   : > { %v1875_v61 = vadd.f32 %v526_v48, %v395_v59 }
  0xf3   : > { %v1412_v62 = vpop.f32.mrf.mxu0  ;;  %v539_v63 = vpop.f32.mrf.mxu1 }
  0xf5   : > { %v400_v1 = vpop.f32.mrf.mxu0  ;;  %v1457_v2 = vpop.f32.mrf.mxu1 }
  0xf6   : > { %v1877_v3 = vadd.f32 %v531_v53, %v400_v1  ;;  %v1903_v2 = vld [vmem:[%s1983_s2] ss:$0 sm:$0xff] }
  0xf7   : > { %v1415_v4 = vpop.f32.mrf.mxu0  ;;  %v542_v5 = vpop.f32.mrf.mxu1 }
  0xf9   : > { %v403_v6 = vpop.f32.mrf.mxu0  ;;  %v1458_v7 = vpop.f32.mrf.mxu1 }
  0xfa   : > { %v1879_v8 = vadd.f32 %v534_v58, %v403_v6 }
  0xfb   : > { %v1416_v9 = vpop.f32.mrf.mxu0  ;;  %v547_v10 = vpop.f32.mrf.mxu1 }
  0xfd   : > { %v408_v11 = vpop.f32.mrf.mxu0  ;;  %v1461_v12 = vpop.f32.mrf.mxu1 }
  0xfe   : > { %v1881_v13 = vadd.f32 %v539_v63, %v408_v11 }
  0xff   : > { %v1419_v14 = vpop.f32.mrf.mxu0  ;;  %v550_v15 = vpop.f32.mrf.mxu1 }
 0x101   : > { %v411_v16 = vpop.f32.mrf.mxu0  ;;  %v1462_v17 = vpop.f32.mrf.mxu1 }
 0x102   : > { %v1883_v18 = vadd.f32 %v542_v5, %v411_v16 }
 0x103   : > { %v1420_v19 = vpop.f32.mrf.mxu0  ;;  %v555_v20 = vpop.f32.mrf.mxu1 }
 0x105   : > { %v416_v21 = vpop.f32.mrf.mxu0  ;;  %v1465_v22 = vpop.f32.mrf.mxu1 }
 0x106   : > { %v1885_v23 = vadd.f32 %v547_v10, %v416_v21 }
 0x107   : > { %v1423_v24 = vpop.f32.mrf.mxu0  ;;  %v558_v25 = vpop.f32.mrf.mxu1 }
 0x109   : > { %v419_v26 = vpop.f32.mrf.mxu0  ;;  %v1466_v27 = vpop.f32.mrf.mxu1 }
 0x10a   : > { %v1887_v28 = vadd.f32 %v550_v15, %v419_v26 }
 0x10b   : > { %v1424_v29 = vpop.f32.mrf.mxu0  ;;  %v563_v30 = vpop.f32.mrf.mxu1 }
 0x10d   : > { %v424_v31 = vpop.f32.mrf.mxu0  ;;  %v1469_v32 = vpop.f32.mrf.mxu1 }
 0x10e   : > { %v1889_v33 = vadd.f32 %v555_v20, %v424_v31 }
 0x10f   : > { %v1427_v34 = vpop.f32.mrf.mxu0  ;;  %v566_v35 = vpop.f32.mrf.mxu1 }
 0x111   : > { %v427_v36 = vpop.f32.mrf.mxu0  ;;  %v1470_v38 = vpop.f32.mrf.mxu1 }
 0x112   : > { %v1891_v39 = vadd.f32 %v558_v25, %v427_v36 }
 0x113   : > { %v1428_v40 = vpop.f32.mrf.mxu0  ;;  %v571_v41 = vpop.f32.mrf.mxu1 }
 0x115   : > { %v432_v0 = vpop.f32.mrf.mxu0  ;;  %v1473_v43 = vpop.f32.mrf.mxu1 }
 0x116   : > { %v1893_v44 = vadd.f32 %v563_v30, %v432_v0 }
 0x117   : > { %v1431_v45 = vpop.f32.mrf.mxu0  ;;  %v574_v47 = vpop.f32.mrf.mxu1 }
 0x119   : > { %v435_v48 = vpop.f32.mrf.mxu0  ;;  %v1474_v49 = vpop.f32.mrf.mxu1 }
 0x11a   : > { %v1895_v50 = vadd.f32 %v566_v35, %v435_v48 }
 0x11b   : > { %v1432_v52 = vpop.f32.mrf.mxu0 }
 0x11d   : > { %v440_v53 = vpop.f32.mrf.mxu0 }
 0x11e   : > { %v1897_v54 = vadd.f32 %v571_v41, %v440_v53 }
 0x11f   : > { %v1435_v55 = vpop.f32.mrf.mxu0 }
 0x121   : > { %v443_v57 = vpop.f32.mrf.mxu0 }
 0x123   : > { %v1436_v58 = vpop.f32.mrf.mxu0 }
 0x14c   : > { %v794_v59 = vpop.f32.mrf.mxu0 }
 0x14d   : > { %v864_v62 = vadd.f32 %v794_v59, %v1865_v37 }
 0x14e   : > { %v1479_v60 = vpop.f32.mrf.mxu0 }
 0x150   : > { %v797_v63 = vpop.f32.mrf.mxu0  ;;  %v988_v1 = vpop.f32.mrf.mxu1 }
 0x151   : > { %v1058_v4 = vadd.f32 %v988_v1, %v864_v62  ;;  %v865_v7 = vadd.f32 %v797_v63, %v1867_v42 }
 0x152   : > { %v1480_v5 = vpop.f32.mrf.mxu0  ;;  %v1517_v6 = vpop.f32.mrf.mxu1 }
 0x153   : > { %v1082_v9 = vadd.f32 %v1903_v2, %v1058_v4 }
 0x154   : > { %v802_v10 = vpop.f32.mrf.mxu0  ;;  %v991_v11 = vpop.f32.mrf.mxu1 }
 0x155   : > { %v1099_v12 = vmax.f32 %v1082_v9, 0.0  ;;  %v1059_v14 = vadd.f32 %v991_v11, %v865_v7  ;;  %v866_v17 = vadd.f32 %v802_v10, %v1869_v46 }
 0x156   : > { %v1483_v37 = vpop.f32.mrf.mxu0  ;;  %v1518_v15 = vpop.f32.mrf.mxu1 }
 0x157   : > { %v1342_v16 = vpack.c.bf16 %v1099_v12, %v1099_v12  ;;  %v1083_v42 = vadd.f32 %v1903_v2, %v1059_v14 }
 0x158   : > { %v805_v19 = vpop.f32.mrf.mxu0  ;;  %v996_v20 = vpop.f32.mrf.mxu1 }
 0x159   : > { %1186 = vst.msk [vmem:[%s1911_s5] sm:$0xf] %vm1185_vm8, %v1342_v16  ;;  %v1100_v21 = vmax.f32 %v1083_v42, 0.0  ;;  %v1060_v22 = vadd.f32 %v996_v20, %v866_v17  ;;  %v867_v27 = vadd.f32 %v805_v19, %v1871_v51 }
 0x15a   : > { %v1484_v24 = vpop.f32.mrf.mxu0  ;;  %v1521_v25 = vpop.f32.mrf.mxu1 }
 0x15b   : > { %v1343_v26 = vpack.c.bf16 %v1100_v21, %v1100_v21  ;;  %v1084_v29 = vadd.f32 %v1903_v2, %v1060_v22 }
 0x15c   : > { %v810_v30 = vpop.f32.mrf.mxu0  ;;  %v999_v31 = vpop.f32.mrf.mxu1 }
 0x15d   : > { %1187 = vst.msk [vmem:[%s1911_s5 + $0x4] sm:$0xf] %vm1185_vm8, %v1343_v26  ;;  %v1101_v46 = vmax.f32 %v1084_v29, 0.0  ;;  %v1061_v32 = vadd.f32 %v999_v31, %v867_v27  ;;  %v868_v38 = vadd.f32 %v810_v30, %v1873_v56 }
 0x15e   : > { %v1487_v34 = vpop.f32.mrf.mxu0  ;;  %v1522_v35 = vpop.f32.mrf.mxu1 }
 0x15f   : > { %v1344_v36 = vpack.c.bf16 %v1101_v46, %v1101_v46  ;;  %v1085_v40 = vadd.f32 %v1903_v2, %v1061_v32 }
 0x160   : > { %v813_v41 = vpop.f32.mrf.mxu0  ;;  %v1004_v0 = vpop.f32.mrf.mxu1 }
 0x161   : > { %1188 = vst.msk [vmem:[%s1911_s5 + $0x8] sm:$0xf] %vm1185_vm8, %v1344_v36  ;;  %v1102_v51 = vmax.f32 %v1085_v40, 0.0  ;;  %v1062_v43 = vadd.f32 %v1004_v0, %v868_v38  ;;  %v869_v49 = vadd.f32 %v813_v41, %v1875_v61 }
 0x162   : > { %v1488_v45 = vpop.f32.mrf.mxu0  ;;  %v1525_v47 = vpop.f32.mrf.mxu1 }
 0x163   : > { %v1345_v48 = vpack.c.bf16 %v1102_v51, %v1102_v51  ;;  %v1086_v52 = vadd.f32 %v1903_v2, %v1062_v43 }
 0x164   : > { %v818_v53 = vpop.f32.mrf.mxu0  ;;  %v1007_v55 = vpop.f32.mrf.mxu1 }
 0x165   : > { %1189 = vst.msk [vmem:[%s1911_s5 + $0xc] sm:$0xf] %vm1185_vm8, %v1345_v48  ;;  %v1103_v56 = vmax.f32 %v1086_v52, 0.0  ;;  %v1063_v57 = vadd.f32 %v1007_v55, %v869_v49  ;;  %v870_v62 = vadd.f32 %v818_v53, %v1877_v3 }
 0x166   : > { %v1491_v58 = vpop.f32.mrf.mxu0  ;;  %v1526_v59 = vpop.f32.mrf.mxu1 }
 0x167   : > { %v1346_v60 = vpack.c.bf16 %v1103_v56, %v1103_v56  ;;  %v1087_v63 = vadd.f32 %v1903_v2, %v1063_v57 }
 0x168   : > { %v821_v1 = vpop.f32.mrf.mxu0  ;;  %v1012_v4 = vpop.f32.mrf.mxu1 }
 0x169   : > { %1190 = vst.msk [vmem:[%s1911_s5 + $0x10] sm:$0xf] %vm1185_vm8, %v1346_v60  ;;  %v1104_v61 = vmax.f32 %v1087_v63, 0.0  ;;  %v1064_v5 = vadd.f32 %v1012_v4, %v870_v62  ;;  %v871_v10 = vadd.f32 %v821_v1, %v1879_v8 }
 0x16a   : > { %v1492_v6 = vpop.f32.mrf.mxu0  ;;  %v1529_v7 = vpop.f32.mrf.mxu1 }
 0x16b   : > { %v1347_v9 = vpack.c.bf16 %v1104_v61, %v1104_v61  ;;  %v1088_v11 = vadd.f32 %v1903_v2, %v1064_v5 }
 0x16c   : > { %v826_v12 = vpop.f32.mrf.mxu0  ;;  %v1015_v14 = vpop.f32.mrf.mxu1 }
 0x16d   : > { %1191 = vst.msk [vmem:[%s1911_s5 + $0x14] sm:$0xf] %vm1185_vm8, %v1347_v9  ;;  %v1105_v3 = vmax.f32 %v1088_v11, 0.0  ;;  %v1065_v37 = vadd.f32 %v1015_v14, %v871_v10  ;;  %v872_v42 = vadd.f32 %v826_v12, %v1881_v13 }
 0x16e   : > { %v1495_v15 = vpop.f32.mrf.mxu0  ;;  %v1530_v16 = vpop.f32.mrf.mxu1 }
 0x16f   : > { %v1348_v17 = vpack.c.bf16 %v1105_v3, %v1105_v3  ;;  %v1089_v19 = vadd.f32 %v1903_v2, %v1065_v37 }
 0x170   : > { %v829_v20 = vpop.f32.mrf.mxu0  ;;  %v1020_v21 = vpop.f32.mrf.mxu1 }
 0x171   : > { %1192 = vst.msk [vmem:[%s1911_s5 + $0x18] sm:$0xf] %vm1185_vm8, %v1348_v17  ;;  %v1106_v8 = vmax.f32 %v1089_v19, 0.0  ;;  %v1066_v22 = vadd.f32 %v1020_v21, %v872_v42  ;;  %v873_v27 = vadd.f32 %v829_v20, %v1883_v18 }
 0x172   : > { %v1496_v24 = vpop.f32.mrf.mxu0  ;;  %v1533_v25 = vpop.f32.mrf.mxu1 }
 0x173   : > { %v1349_v26 = vpack.c.bf16 %v1106_v8, %v1106_v8  ;;  %v1090_v29 = vadd.f32 %v1903_v2, %v1066_v22 }
 0x174   : > { %v834_v30 = vpop.f32.mrf.mxu0  ;;  %v1023_v31 = vpop.f32.mrf.mxu1 }
 0x175   : > { %1193 = vst.msk [vmem:[%s1911_s5 + $0x1c] sm:$0xf] %vm1185_vm8, %v1349_v26  ;;  %v1107_v13 = vmax.f32 %v1090_v29, 0.0  ;;  %v1067_v46 = vadd.f32 %v1023_v31, %v873_v27  ;;  %v874_v36 = vadd.f32 %v834_v30, %v1885_v23 }
 0x176   : > { %v1499_v32 = vpop.f32.mrf.mxu0  ;;  %v1534_v34 = vpop.f32.mrf.mxu1 }
 0x177   : > { %v1350_v35 = vpack.c.bf16 %v1107_v13, %v1107_v13  ;;  %v1091_v38 = vadd.f32 %v1903_v2, %v1067_v46 }
 0x178   : > { %v837_v40 = vpop.f32.mrf.mxu0  ;;  %v1028_v41 = vpop.f32.mrf.mxu1 }
 0x179   : > { %1194 = vst.msk [vmem:[%s1911_s5 + $0x20] sm:$0xf] %vm1185_vm8, %v1350_v35  ;;  %v1108_v18 = vmax.f32 %v1091_v38, 0.0  ;;  %v1068_v0 = vadd.f32 %v1028_v41, %v874_v36  ;;  %v875_v47 = vadd.f32 %v837_v40, %v1887_v28 }
 0x17a   : > { %v1500_v51 = vpop.f32.mrf.mxu0  ;;  %v1537_v43 = vpop.f32.mrf.mxu1 }
 0x17b   : > { %v1351_v45 = vpack.c.bf16 %v1108_v18, %v1108_v18  ;;  %v1092_v48 = vadd.f32 %v1903_v2, %v1068_v0 }
 0x17c   : > { %v842_v49 = vpop.f32.mrf.mxu0  ;;  %v1031_v52 = vpop.f32.mrf.mxu1 }
 0x17d   : > { %1195 = vst.msk [vmem:[%s1911_s5 + $0x24] sm:$0xf] %vm1185_vm8, %v1351_v45  ;;  %v1109_v23 = vmax.f32 %v1092_v48, 0.0  ;;  %v1069_v53 = vadd.f32 %v1031_v52, %v875_v47  ;;  %v876_v58 = vadd.f32 %v842_v49, %v1889_v33 }
 0x17e   : > { %v1503_v55 = vpop.f32.mrf.mxu0  ;;  %v1538_v56 = vpop.f32.mrf.mxu1 }
 0x17f   : > { %v1352_v57 = vpack.c.bf16 %v1109_v23, %v1109_v23  ;;  %v1093_v59 = vadd.f32 %v1903_v2, %v1069_v53 }
 0x180   : > { %v845_v60 = vpop.f32.mrf.mxu0  ;;  %v1036_v62 = vpop.f32.mrf.mxu1 }
 0x181   : > { %1196 = vst.msk [vmem:[%s1911_s5 + $0x28] sm:$0xf] %vm1185_vm8, %v1352_v57  ;;  %v1110_v28 = vmax.f32 %v1093_v59, 0.0  ;;  %v1070_v63 = vadd.f32 %v1036_v62, %v876_v58  ;;  %v877_v5 = vadd.f32 %v845_v60, %v1891_v39 }
 0x182   : > { %v1504_v1 = vpop.f32.mrf.mxu0  ;;  %v1541_v4 = vpop.f32.mrf.mxu1 }
 0x183   : > { %v1353_v61 = vpack.c.bf16 %v1110_v28, %v1110_v28  ;;  %v1094_v6 = vadd.f32 %v1903_v2, %v1070_v63 }
 0x184   : > { %v850_v7 = vpop.f32.mrf.mxu0  ;;  %v1039_v9 = vpop.f32.mrf.mxu1 }
 0x185   : > { %1197 = vst.msk [vmem:[%s1911_s5 + $0x2c] sm:$0xf] %vm1185_vm8, %v1353_v61  ;;  %v1111_v33 = vmax.f32 %v1094_v6, 0.0  ;;  %v1071_v10 = vadd.f32 %v1039_v9, %v877_v5  ;;  %v878_v3 = vadd.f32 %v850_v7, %v1893_v44 }
 0x186   : > { %v1507_v11 = vpop.f32.mrf.mxu0  ;;  %v1542_v12 = vpop.f32.mrf.mxu1 }
 0x187   : > { %v1354_v14 = vpack.c.bf16 %v1111_v33, %v1111_v33  ;;  %v1095_v37 = vadd.f32 %v1903_v2, %v1071_v10 }
 0x188   : > { %v853_v15 = vpop.f32.mrf.mxu0  ;;  %v1044_v16 = vpop.f32.mrf.mxu1 }
 0x189   : > { %1198 = vst.msk [vmem:[%s1911_s5 + $0x30] sm:$0xf] %vm1185_vm8, %v1354_v14  ;;  %v1112_v39 = vmax.f32 %v1095_v37, 0.0  ;;  %v1072_v17 = vadd.f32 %v1044_v16, %v878_v3  ;;  %v879_v21 = vadd.f32 %v853_v15, %v1895_v50 }
 0x18a   : > { %v1508_v42 = vpop.f32.mrf.mxu0  ;;  %v1545_v19 = vpop.f32.mrf.mxu1 }
 0x18b   : > { %v1355_v20 = vpack.c.bf16 %v1112_v39, %v1112_v39  ;;  %v1096_v8 = vadd.f32 %v1903_v2, %v1072_v17 }
 0x18c   : > { %v858_v22 = vpop.f32.mrf.mxu0  ;;  %v1047_v24 = vpop.f32.mrf.mxu1 }
 0x18d   : > { %1199 = vst.msk [vmem:[%s1911_s5 + $0x34] sm:$0xf] %vm1185_vm8, %v1355_v20  ;;  %v1113_v44 = vmax.f32 %v1096_v8, 0.0  ;;  %v1073_v25 = vadd.f32 %v1047_v24, %v879_v21  ;;  %v880_v30 = vadd.f32 %v858_v22, %v1897_v54 }
 0x18e   : > { %v1511_v26 = vpop.f32.mrf.mxu0  ;;  %v1546_v27 = vpop.f32.mrf.mxu1 }
 0x18f   : > { %v1356_v29 = vpack.c.bf16 %v1113_v44, %v1113_v44  ;;  %v1097_v31 = vadd.f32 %v1903_v2, %v1073_v25 }
 0x190   : > { %v861_v13 = vpop.f32.mrf.mxu0  ;;  %v1052_v46 = vpop.f32.mrf.mxu1 }
 0x191   : > { %1200 = vst.msk [vmem:[%s1911_s5 + $0x38] sm:$0xf] %vm1185_vm8, %v1356_v29  ;;  %v1114_v50 = vmax.f32 %v1097_v31, 0.0  ;;  %v1074_v32 = vadd.f32 %v1052_v46, %v880_v30 }
 0x192   : > { %v1512_v34 = vpop.f32.mrf.mxu0  ;;  %v1549_v35 = vpop.f32.mrf.mxu1 }
 0x193   : > { %v1357_v36 = vpack.c.bf16 %v1114_v50, %v1114_v50  ;;  %v1098_v38 = vadd.f32 %v1903_v2, %v1074_v32 }
 0x194   : > { %v1055_v40 = vpop.f32.mrf.mxu1 }
 0x195   : > { %1201 = vst.msk [vmem:[%s1911_s5 + $0x3c] sm:$0xf] %vm1185_vm8, %v1357_v36  ;;  %v1115_v41 = vmax.f32 %v1098_v38, 0.0 }
 0x196   : > { %v1550_v18 = vpop.f32.mrf.mxu1 }
 0x197   : > { %v1358_v54 = vpack.c.bf16 %v1115_v41, %v1115_v41 }
 0x199   : > { %1202 = vst.msk [vmem:[%s1911_s5 + $0x40] sm:$0xf] %vm1185_vm8, %v1358_v54 }
 0x19a PF: > { %s13_s12 = sadd.s32 1, %s1591_s12  }
 0x19b   : > { %p10_p4 = scmp.ge.s32.totalorder %s13_s12, 6  }
 0x19d   :  { %12 = sbr.rel (!%p10_p4) target bundleno = 1 (0x1), region = 62 }

// kernel: forward.6
= control target key start
LH: loop header
LB: loop body
LE: loop exit
PB: predicated region body
PF: predicated region fallthrough
CT: control target
= control target key end

     0   :  { %s1124_s12 = smov 0   ;;  %s1316_s0 = inlined_call_operand.vmem [shape: bf16[2,90,32], index: 0, kind: input, shape index: {}]   ;;  %s1317_s1 = inlined_call_operand.vmem [shape: bf16[72,16], index: 1, kind: input, shape index: {}]   ;;  %s1318_s2 = inlined_call_operand.vmem [shape: f32[1,16], index: 2, kind: input, shape index: {}]   ;;  %s1319_s3 = inlined_call_operand.vmem [shape: bf16[2,72,16], index: 3, kind: output, shape index: {}]  }
   0x1 LB: > { %s885_s13 = sadd.s32 4294967295, %s1099_s12   ;;  %p889_p0 = scmp.ge.s32.totalorder %s1099_s12, 1  ;;  %s1099_s12 = sphi %s1124_s12, %s13_s12  }
   0x2   : > { %p137_p1 = scmp.lt.s32.totalorder %s1099_s12, 3 }
   0x4   : > { %p138_p2 = pnand %p889_p0, %p137_p1 }
   0x5   : > { %p161_p3 = scmp.lt.s32.totalorder (!%p138_p2), %s885_s13, 1  ;;  %s1103_s26 = smov (!%p138_p2), 120  }
   0x6   : > { %141 = sbr.rel (%p138_p2) target bundleno = 378 (0x17a), region = 32 }
   0xb   : > { %v1101_v0 = vmov 0.0   ;;  %v1083_v1 = vld [vmem:[%s1317_s1 + $0x8] sm:$0xff]   ;;  %s1321_s13 = smov (!%p161_p3, %s885_s13), 1  ;;  %v1084_v2 = vld [vmem:[%s1317_s1 + $0x10] sm:$0xff]   ;;  %vm1102_vm0 = vmmov 0   ;;  %v1085_v3 = vld [vmem:[%s1317_s1] sm:$0xff]  }
   0xc   : > { %996 = vmatprep.subr.bf16.mxu1 %v1101_v0  ;;  %974 = vmatprep.subr.bf16.mxu0 %v1101_v0  ;;  %s1064_s20 = smul.u32 48, %s1321_s13  ;;  %vm213_vm1 = vsmask.f32 7424  ;;  %v633_v4 = vld [vmem:[%s1317_s1 + $0x20] sm:$0xf]  ;;  %vm673_vm2 = vcmask 1043456  }
   0xd   : > { %976 = vmatprep.mubr.msk.bf16.mxu0 %vm1102_vm0, %v1101_v0  ;;  %1000 = vmatprep.mubr.msk.bf16.mxu1 %vm1102_vm0, %v1101_v0  ;;  %vm637_vm3 = vcmask 1046528   ;;  %vm360_vm4 = vcmask 261120   ;;  %v675_v15 = vsel %vm673_vm2, %v633_v4, 0  ;;  %vm259_vm5 = vcmask 130048   ;;  %v1088_v53 = vld [vmem:[%s1317_s1 + $0x18] sm:$0xff]   ;;  %s1065_s4 = smul.u32 36, %s1321_s13 }
   0xe   : > { %997 = vmatpush3.bf16.msra.mxu1 %v1083_v1  ;;  %975 = vmatpush3.bf16.msra.mxu0 %v1084_v2  ;;  %s1155_s23 = scalar_lea.vmem %s1316_s0, %s1064_s20  ;;  %vm657_vm6 = vcmask 64512   ;;  %vm820_vm7 = vcmask 125952  }
   0xf   : > { %998 = vmatprep.subr.bf16.mxu1 %v1101_v0  ;;  %1020 = vmatprep.subr.bf16.mxu0 %v1101_v0  ;;  %v444_v5 = vld [vmem:[%s1155_s23 + $0x4] sm:$0xf]  ;;  %v445_v6 = vld [vmem:[%s1155_s23 + $0x8] sm:$0xf]  ;;  %v1078_v8 = vld [vmem:[%s1155_s23 + $0xc] sm:$0xff]   ;;  %s1280_s7 = scalar_lea.vmem %s1319_s3, %s1065_s4 }
  0x10   : > { %v911_v7 = vcombine.low %v444_v5, %v445_v6  ;;  %v632_v9 = vld [vmem:[%s1155_s23 + $0x4] sm:$0xe]  ;;  %v1080_v11 = vld [vmem:[%s1155_s23 + $0x14] sm:$0xff]   ;;  %v489_v14 = vshll.u32 %v1078_v8, 16  ;;  %v639_v17 = vrot.slane %v1078_v8, 1  ;;  %v493_v18 = vshrl.u32 %v1078_v8, 16 }
  0x11   : > { %v922_v10 = vcombine.low %v632_v9, %v445_v6  ;;  %v497_v19 = vshll.u32 %v1080_v11, 16  ;;  %v641_v22 = vrot.slane %v1080_v11, 1  ;;  %v1081_v23 = vld [vmem:[%s1155_s23 + $0x1c] sm:$0xff]   ;;  %v1168_v25 = vld [vmem:[%s1155_s23 + $0x24] sm:$0x1f]   ;;  %v501_v29 = vshrl.u32 %v1080_v11, 16 }
  0x12   : > { %999 = vmatpush3.bf16.msra.mxu1 %v1085_v3  ;;  %v482_v12 = vshrl.u32 %v911_v7, 16  ;;  %v484_v13 = vshll.u32 %v911_v7, 16  ;;  %v491_v21 = vrot.slane %v489_v14, 1  ;;  %v1086_v26 = vld [vmem:[%s1155_s23] sm:$0xff]   ;;  %v505_v30 = vshll.u32 %v1081_v23, 16  ;;  %v1087_v31 = vld [vmem:[%s1155_s23 + $0x8] sm:$0xff]  }
  0x13   : > { %1042 = vmatprep.subr.bf16.mxu1 %v1101_v0  ;;  %v638_v16 = vrot.slane %v922_v10, 1  ;;  %v499_v24 = vrot.slane %v497_v19, 1  ;;  %v643_v35 = vrot.slane %v1081_v23, 1  ;;  %v509_v37 = vshrl.u32 %v1081_v23, 16  ;;  %v1089_v44 = vld [vmem:[%s1155_s23 + $0x10] sm:$0xff]   ;;  %v1090_v62 = vld [vmem:[%s1155_s23 + $0x18] sm:$0xff]  }
  0x14   : > { %v486_v20 = vrot.slane %v484_v13, 1  ;;  %v495_v28 = vor.u32 %v493_v18, %v491_v21  ;;  %v507_v36 = vrot.slane %v505_v30, 1  ;;  %v513_v38 = vshll.u32 %v1168_v25, 16  ;;  %v180_v4 = vld [vmem:[%s1155_s23 + $0x20] sm:$0xf] }
  0x15   : > { %1001 = vmatmul.mubr.msk.bf16.vlgmr.msra.gmra.mxu1 %vm360_vm4, %v1086_v26  ;;  %v640_v33 = vsel %vm637_vm3, %v638_v16, %v639_v17  ;;  %v215_v39 = vshrl.u32 %v1086_v26, 16  ;;  %v642_v40 = vsel %vm637_vm3, %v639_v17, %v641_v22  ;;  %v503_v41 = vor.u32 %v501_v29, %v499_v24  ;;  %v185_v5 = vld [vmem:[%s1155_s23 + $0x24] sm:$0x1] }
  0x16   : > { %v487_v27 = vor.u32 %v486_v20, %v482_v12  ;;  %v500_v34 = vsel %vm213_vm1, %v495_v28, %v499_v24  ;;  %1043 = vmatpush3.bf16.msra.mxu1 %v675_v15  ;;  %1004 = vmatprep.mubr.msk.bf16.mxu1 %vm1102_vm0, %v1101_v0  ;;  %v217_v42 = vshll.u32 %v1086_v26, 16  ;;  %v222_v43 = vshll.u32 %v1087_v31, 16 }
  0x17   : > { %522 = vrot.lane.b32.xlu1 %v500_v34, %s1103_s26  ;;  %v644_v47 = vsel %vm637_vm3, %v641_v22, %v643_v35  ;;  %v645_v48 = vrot.slane %v1168_v25, 1  ;;  %v508_v49 = vsel %vm213_vm1, %v503_v41, %v507_v36  ;;  %v511_v50 = vor.u32 %v509_v37, %v507_v36 }
  0x18   : > { %v492_v32 = vsel %vm213_vm1, %v487_v27, %v491_v21  ;;  %v219_v45 = vrot.slane %v217_v42, 1  ;;  %v224_v46 = vrot.slane %v222_v43, 1  ;;  %v515_v51 = vrot.slane %v513_v38, 1 }
  0x19   : > { %520 = vrot.lane.b32.xlu0 %v492_v32, %s1103_s26  ;;  %v226_v54 = vshrl.u32 %v1087_v31, 16  ;;  %v230_v55 = vshll.u32 %v1089_v44, 16  ;;  %v517_v57 = vshrl.u32 %v1168_v25, 16  ;;  %v646_v59 = vsel %vm637_vm3, %v643_v35, %v645_v48 }
  0x1a   : > { %v220_v52 = vor.u32 %v219_v45, %v215_v39  ;;  %v516_v58 = vsel %vm213_vm1, %v511_v50, %v515_v51  ;;  %v234_v2 = vshrl.u32 %v1089_v44, 16  ;;  %v238_v3 = vshll.u32 %v1090_v62, 16 }
  0x1b   : > { %649 = vrot.lane.b32.xlu1 %v642_v40, %s1103_s26  ;;  %v228_v60 = vor.u32 %v226_v54, %v224_v46  ;;  %v232_v61 = vrot.slane %v230_v55, 1  ;;  %v519_v63 = vor.u32 %v517_v57, %v515_v51  ;;  %v896_v8 = vcombine.low %v180_v4, %v185_v5 }
  0x1c   : > { %v225_v56 = vsel %vm213_vm1, %v220_v52, %v224_v46  ;;  %v240_v7 = vrot.slane %v238_v3, 1  ;;  %v242_v10 = vshrl.u32 %v1090_v62, 16  ;;  %v903_v14 = vcombine.low %v180_v4, %v180_v4 }
  0x1d   : > { %647 = vrot.lane.b32.xlu0 %v640_v33, %s1103_s26  ;;  %1005 = vmatmul.mubr.msk.bf16.gmra.mxu1 %vm360_vm4, %v1087_v31  ;;  %v233_v1 = vsel %vm213_vm1, %v228_v60, %v232_v61  ;;  %v236_v6 = vor.u32 %v234_v2, %v232_v61  ;;  %v246_v11 = vshll.u32 %v896_v8, 16  ;;  %v250_v16 = vshrl.u32 %v896_v8, 16 }
  0x1e   : > { %1008 = vmatprep.mubr.msk.bf16.mxu1 %vm1102_vm0, %v1101_v0  ;;  %977 = vmatmul.mubr.msk.bf16.vlgmr.msra.gmra.mxu0 %vm259_vm5, %v225_v56  ;;  %v244_v12 = vor.u32 %v242_v10, %v240_v7 }
  0x1f   : > { %651 = vrot.lane.b32.xlu1 %v644_v47, %s1103_s26  ;;  %1021 = vmatpush3.bf16.msra.mxu0 %v1088_v53  ;;  %v241_v9 = vsel %vm213_vm1, %v236_v6, %v240_v7  ;;  %v248_v13 = vrot.slane %v246_v11, 1 }
  0x20   : > { %980 = vmatprep.mubr.msk.bf16.mxu0 %vm1102_vm0, %v1101_v0 }
  0x21   : > { %524 = vrot.lane.b32.xlu0 %v508_v49, %s1103_s26  ;;  %v249_v15 = vsel %vm213_vm1, %v244_v12, %v248_v13  ;;  %v252_v17 = vor.u32 %v250_v16, %v248_v13 }
  0x23   : > { %653 = vrot.lane.b32.xlu1 %v646_v59, %s1103_s26 }
  0x25   : > { %526 = vrot.lane.b32.xlu0 %v516_v58, %s1103_s26  ;;  %1009 = vmatmul.mubr.msk.bf16.gmra.mxu1 %vm360_vm4, %v1089_v44 }
  0x26   : > { %1012 = vmatprep.mubr.msk.bf16.mxu1 %vm1102_vm0, %v1101_v0  ;;  %981 = vmatmul.mubr.msk.bf16.gmra.mxu0 %vm259_vm5, %v233_v1 }
  0x27   : > { %655 = vrot.lane.b32.xlu1 %v645_v48, %s1103_s26  ;;  %984 = vmatprep.mubr.msk.bf16.mxu0 %vm1102_vm0, %v1101_v0 }
  0x29   : > { %528 = vrot.lane.b32.xlu0 %v519_v63, %s1103_s26 }
  0x2d   : > { %1013 = vmatmul.mubr.msk.bf16.gmra.mxu1 %vm360_vm4, %v1090_v62 }
  0x2e   : > { %1016 = vmatprep.mubr.msk.bf16.mxu1 %vm1102_vm0, %v1101_v0  ;;  %985 = vmatmul.mubr.msk.bf16.gmra.mxu0 %vm259_vm5, %v241_v9 }
  0x2f   : > { %988 = vmatprep.mubr.msk.bf16.mxu0 %vm1102_vm0, %v1101_v0 }
  0x35   : > { %1017 = vmatmul.mubr.msk.bf16.gmra.mxu1 %vm360_vm4, %v903_v14 }
  0x36   : > { %1044 = vmatprep.mubr.msk.bf16.mxu1 %vm1102_vm0, %v1101_v0  ;;  %989 = vmatmul.mubr.msk.bf16.gmra.mxu0 %vm259_vm5, %v249_v15 }
  0x37   : > { %992 = vmatprep.mubr.msk.bf16.mxu0 %vm1102_vm0, %v1101_v0 }
  0x3e   : > { %993 = vmatmul.mubr.msk.bf16.gmra.mxu0 %vm259_vm5, %v252_v17 }
  0x3f   : > { %1022 = vmatprep.mubr.msk.bf16.mxu0 %vm1102_vm0, %v1101_v0 }
  0x89   : > { %v523_v20 = vpop.permute.xlu1 %522 }
  0x8b   : > { %v521_v18 = vpop.permute.xlu0 %520 }
  0x8c   : > { %1023 = vmatmul.mubr.msk.bf16.vlgmr.msra.gmra.mxu0 %vm259_vm5, %v521_v18  ;;  %v1273_v18 = vld [vmem:[%s1318_s2] ss:$0 sm:$0xff] }
  0x8d   : > { %1026 = vmatprep.mubr.msk.bf16.mxu0 %vm1102_vm0, %v1101_v0  ;;  %v650_v21 = vpop.permute.xlu1 %649 }
  0x8f   : > { %v648_v19 = vpop.permute.xlu0 %647 }
  0x90   : > { %1045 = vmatmul.mubr.msk.bf16.vlgmr.msra.gmra.mxu1 %vm657_vm6, %v648_v19 }
  0x91   : > { %1048 = vmatprep.mubr.msk.bf16.mxu1 %vm1102_vm0, %v1101_v0  ;;  %v652_v23 = vpop.permute.xlu1 %651 }
  0x93   : > { %v525_v22 = vpop.permute.xlu0 %524 }
  0x94   : > { %1027 = vmatmul.mubr.msk.bf16.gmra.mxu0 %vm259_vm5, %v523_v20 }
  0x95   : > { %1030 = vmatprep.mubr.msk.bf16.mxu0 %vm1102_vm0, %v1101_v0  ;;  %v654_v25 = vpop.permute.xlu1 %653 }
  0x97   : > { %v527_v24 = vpop.permute.xlu0 %526 }
  0x98   : > { %1049 = vmatmul.mubr.msk.bf16.gmra.mxu1 %vm657_vm6, %v650_v21 }
  0x99   : > { %1052 = vmatprep.mubr.msk.bf16.mxu1 %vm1102_vm0, %v1101_v0  ;;  %v656_v27 = vpop.permute.xlu1 %655 }
  0x9b   : > { %v529_v26 = vpop.permute.xlu0 %528 }
  0x9c   : > { %1031 = vmatmul.mubr.msk.bf16.gmra.mxu0 %vm259_vm5, %v525_v22 }
  0x9d   : > { %1034 = vmatprep.mubr.msk.bf16.mxu0 %vm1102_vm0, %v1101_v0 }
  0xa0   : > { %1053 = vmatmul.mubr.msk.bf16.gmra.mxu1 %vm657_vm6, %v652_v23 }
  0xa1   : > { %1056 = vmatprep.mubr.msk.bf16.mxu1 %vm1102_vm0, %v1101_v0 }
  0xa4   : > { %1035 = vmatmul.mubr.msk.bf16.gmra.mxu0 %vm259_vm5, %v527_v24 }
  0xa5   : > { %1038 = vmatprep.mubr.msk.bf16.mxu0 %vm1102_vm0, %v1101_v0 }
  0xa8   : > { %1057 = vmatmul.mubr.msk.bf16.gmra.mxu1 %vm657_vm6, %v654_v25 }
  0xa9   : > { %1060 = vmatprep.mubr.msk.bf16.mxu1 %vm1102_vm0, %v1101_v0 }
  0xac   : > { %1039 = vmatmul.mubr.msk.bf16.gmra.mxu0 %vm259_vm5, %v529_v26 }
  0xb0   : > { %1061 = vmatmul.mubr.msk.bf16.gmra.mxu1 %vm657_vm6, %v656_v27 }
  0xd5   : > { %v406_v28 = vpop.f32.mrf.mxu1 }
  0xd7   : > { %v1002_v29 = vpop.f32.mrf.mxu1 }
  0xd9   : > { %v409_v30 = vpop.f32.mrf.mxu1 }
  0xdb   : > { %v1003_v31 = vpop.f32.mrf.mxu1 }
  0xdd   : > { %v414_v32 = vpop.f32.mrf.mxu1 }
  0xde   : > { %v309_v34 = vpop.f32.mrf.mxu0 }
  0xdf   : > { %v1006_v33 = vpop.f32.mrf.mxu1  ;;  %v407_v35 = vadd.f32 %v406_v28, %v309_v34 }
  0xe0   : > { %v978_v37 = vpop.f32.mrf.mxu0 }
  0xe1   : > { %v417_v36 = vpop.f32.mrf.mxu1 }
  0xe2   : > { %v312_v39 = vpop.f32.mrf.mxu0 }
  0xe3   : > { %v1007_v38 = vpop.f32.mrf.mxu1  ;;  %v410_v40 = vadd.f32 %v409_v30, %v312_v39 }
  0xe4   : > { %v979_v0 = vpop.f32.mrf.mxu0 }
  0xe5   : > { %v422_v41 = vpop.f32.mrf.mxu1 }
  0xe6   : > { %v317_v43 = vpop.f32.mrf.mxu0 }
  0xe7   : > { %v1010_v42 = vpop.f32.mrf.mxu1  ;;  %v415_v44 = vadd.f32 %v414_v32, %v317_v43 }
  0xe8   : > { %v982_v46 = vpop.f32.mrf.mxu0 }
  0xe9   : > { %v425_v45 = vpop.f32.mrf.mxu1 }
  0xea   : > { %v320_v48 = vpop.f32.mrf.mxu0 }
  0xeb   : > { %v1011_v47 = vpop.f32.mrf.mxu1  ;;  %v418_v49 = vadd.f32 %v417_v36, %v320_v48 }
  0xec   : > { %v983_v51 = vpop.f32.mrf.mxu0 }
  0xed   : > { %v430_v50 = vpop.f32.mrf.mxu1 }
  0xee   : > { %v325_v53 = vpop.f32.mrf.mxu0 }
  0xef   : > { %v1014_v52 = vpop.f32.mrf.mxu1  ;;  %v1260_v54 = vadd.f32 %v422_v41, %v325_v53 }
  0xf0   : > { %v986_v56 = vpop.f32.mrf.mxu0 }
  0xf1   : > { %v433_v55 = vpop.f32.mrf.mxu1 }
  0xf2   : > { %v328_v58 = vpop.f32.mrf.mxu0 }
  0xf3   : > { %v1015_v57 = vpop.f32.mrf.mxu1  ;;  %v1262_v59 = vadd.f32 %v425_v45, %v328_v58 }
  0xf4   : > { %v987_v61 = vpop.f32.mrf.mxu0 }
  0xf5   : > { %v438_v60 = vpop.f32.mrf.mxu1 }
  0xf6   : > { %v333_v63 = vpop.f32.mrf.mxu0 }
  0xf7   : > { %v1018_v62 = vpop.f32.mrf.mxu1  ;;  %v1264_v1 = vadd.f32 %v430_v50, %v333_v63 }
  0xf8   : > { %v990_v3 = vpop.f32.mrf.mxu0 }
  0xf9   : > { %v441_v2 = vpop.f32.mrf.mxu1 }
  0xfa   : > { %v336_v5 = vpop.f32.mrf.mxu0 }
  0xfb   : > { %v1019_v4 = vpop.f32.mrf.mxu1  ;;  %v1266_v6 = vadd.f32 %v433_v55, %v336_v5 }
  0xfc   : > { %v991_v7 = vpop.f32.mrf.mxu0 }
  0xfe   : > { %v341_v8 = vpop.f32.mrf.mxu0 }
  0xff   : > { %v1268_v9 = vadd.f32 %v438_v60, %v341_v8 }
 0x100   : > { %v994_v10 = vpop.f32.mrf.mxu0 }
 0x102   : > { %v344_v11 = vpop.f32.mrf.mxu0 }
 0x104   : > { %v995_v12 = vpop.f32.mrf.mxu0 }
 0x14c   : > { %v585_v13 = vpop.f32.mrf.mxu0 }
 0x14d   : > { %v623_v15 = vadd.f32 %v585_v13, %v407_v35 }
 0x14e   : > { %v1024_v14 = vpop.f32.mrf.mxu0 }
 0x150   : > { %v588_v16 = vpop.f32.mrf.mxu0  ;;  %v711_v17 = vpop.f32.mrf.mxu1 }
 0x151   : > { %v749_v19 = vadd.f32 %v711_v17, %v623_v15  ;;  %v624_v22 = vadd.f32 %v588_v16, %v410_v40 }
 0x152   : > { %v1025_v20 = vpop.f32.mrf.mxu0  ;;  %v1046_v21 = vpop.f32.mrf.mxu1 }
 0x153   : > { %v765_v23 = vadd.f32 %v1273_v18, %v749_v19 }
 0x154   : > { %v593_v24 = vpop.f32.mrf.mxu0  ;;  %v714_v25 = vpop.f32.mrf.mxu1 }
 0x155   : > { %v774_v26 = vmax.f32 %v765_v23, 0.0  ;;  %v750_v27 = vadd.f32 %v714_v25, %v624_v22  ;;  %v625_v31 = vadd.f32 %v593_v24, %v415_v44 }
 0x156   : > { %v1028_v28 = vpop.f32.mrf.mxu0  ;;  %v1047_v29 = vpop.f32.mrf.mxu1 }
 0x157   : > { %v940_v30 = vpack.c.bf16 %v774_v26, %v774_v26  ;;  %v766_v32 = vadd.f32 %v1273_v18, %v750_v27 }
 0x158   : > { %v596_v33 = vpop.f32.mrf.mxu0  ;;  %v719_v34 = vpop.f32.mrf.mxu1 }
 0x159   : > { %821 = vst.msk [vmem:[%s1280_s7] sm:$0xf] %vm820_vm7, %v940_v30  ;;  %v775_v35 = vmax.f32 %v766_v32, 0.0  ;;  %v751_v36 = vadd.f32 %v719_v34, %v625_v31  ;;  %v626_v40 = vadd.f32 %v596_v33, %v418_v49 }
 0x15a   : > { %v1029_v37 = vpop.f32.mrf.mxu0  ;;  %v1050_v38 = vpop.f32.mrf.mxu1 }
 0x15b   : > { %v941_v39 = vpack.c.bf16 %v775_v35, %v775_v35  ;;  %v767_v41 = vadd.f32 %v1273_v18, %v751_v36 }
 0x15c   : > { %v601_v0 = vpop.f32.mrf.mxu0  ;;  %v722_v42 = vpop.f32.mrf.mxu1 }
 0x15d   : > { %822 = vst.msk [vmem:[%s1280_s7 + $0x4] sm:$0xf] %vm820_vm7, %v941_v39  ;;  %v776_v43 = vmax.f32 %v767_v41, 0.0  ;;  %v752_v44 = vadd.f32 %v722_v42, %v626_v40  ;;  %v627_v48 = vadd.f32 %v601_v0, %v1260_v54 }
 0x15e   : > { %v1032_v45 = vpop.f32.mrf.mxu0  ;;  %v1051_v46 = vpop.f32.mrf.mxu1 }
 0x15f   : > { %v942_v47 = vpack.c.bf16 %v776_v43, %v776_v43  ;;  %v768_v50 = vadd.f32 %v1273_v18, %v752_v44 }
 0x160   : > { %v604_v51 = vpop.f32.mrf.mxu0  ;;  %v727_v52 = vpop.f32.mrf.mxu1 }
 0x161   : > { %823 = vst.msk [vmem:[%s1280_s7 + $0x8] sm:$0xf] %vm820_vm7, %v942_v47  ;;  %v777_v49 = vmax.f32 %v768_v50, 0.0  ;;  %v753_v53 = vadd.f32 %v727_v52, %v627_v48  ;;  %v628_v58 = vadd.f32 %v604_v51, %v1262_v59 }
 0x162   : > { %v1033_v55 = vpop.f32.mrf.mxu0  ;;  %v1054_v56 = vpop.f32.mrf.mxu1 }
 0x163   : > { %v943_v57 = vpack.c.bf16 %v777_v49, %v777_v49  ;;  %v769_v60 = vadd.f32 %v1273_v18, %v753_v53 }
 0x164   : > { %v609_v61 = vpop.f32.mrf.mxu0  ;;  %v730_v62 = vpop.f32.mrf.mxu1 }
 0x165   : > { %824 = vst.msk [vmem:[%s1280_s7 + $0xc] sm:$0xf] %vm820_vm7, %v943_v57  ;;  %v778_v54 = vmax.f32 %v769_v60, 0.0  ;;  %v754_v63 = vadd.f32 %v730_v62, %v628_v58  ;;  %v629_v5 = vadd.f32 %v609_v61, %v1264_v1 }
 0x166   : > { %v1036_v2 = vpop.f32.mrf.mxu0  ;;  %v1055_v3 = vpop.f32.mrf.mxu1 }
 0x167   : > { %v944_v4 = vpack.c.bf16 %v778_v54, %v778_v54  ;;  %v770_v7 = vadd.f32 %v1273_v18, %v754_v63 }
 0x168   : > { %v612_v8 = vpop.f32.mrf.mxu0  ;;  %v735_v10 = vpop.f32.mrf.mxu1 }
 0x169   : > { %825 = vst.msk [vmem:[%s1280_s7 + $0x10] sm:$0xf] %vm820_vm7, %v944_v4  ;;  %v779_v59 = vmax.f32 %v770_v7, 0.0  ;;  %v755_v11 = vadd.f32 %v735_v10, %v629_v5  ;;  %v630_v15 = vadd.f32 %v612_v8, %v1266_v6 }
 0x16a   : > { %v1037_v12 = vpop.f32.mrf.mxu0  ;;  %v1058_v13 = vpop.f32.mrf.mxu1 }
 0x16b   : > { %v945_v14 = vpack.c.bf16 %v779_v59, %v779_v59  ;;  %v771_v16 = vadd.f32 %v1273_v18, %v755_v11 }
 0x16c   : > { %v617_v17 = vpop.f32.mrf.mxu0  ;;  %v738_v19 = vpop.f32.mrf.mxu1 }
 0x16d   : > { %826 = vst.msk [vmem:[%s1280_s7 + $0x14] sm:$0xf] %vm820_vm7, %v945_v14  ;;  %v780_v1 = vmax.f32 %v771_v16, 0.0  ;;  %v756_v20 = vadd.f32 %v738_v19, %v630_v15  ;;  %v631_v24 = vadd.f32 %v617_v17, %v1268_v9 }
 0x16e   : > { %v1040_v21 = vpop.f32.mrf.mxu0  ;;  %v1059_v22 = vpop.f32.mrf.mxu1 }
 0x16f   : > { %v946_v23 = vpack.c.bf16 %v780_v1, %v780_v1  ;;  %v772_v25 = vadd.f32 %v1273_v18, %v756_v20 }
 0x170   : > { %v620_v26 = vpop.f32.mrf.mxu0  ;;  %v743_v27 = vpop.f32.mrf.mxu1 }
 0x171   : > { %827 = vst.msk [vmem:[%s1280_s7 + $0x18] sm:$0xf] %vm820_vm7, %v946_v23  ;;  %v781_v6 = vmax.f32 %v772_v25, 0.0  ;;  %v757_v28 = vadd.f32 %v743_v27, %v631_v24 }
 0x172   : > { %v1041_v29 = vpop.f32.mrf.mxu0  ;;  %v1062_v30 = vpop.f32.mrf.mxu1 }
 0x173   : > { %v947_v31 = vpack.c.bf16 %v781_v6, %v781_v6  ;;  %v773_v32 = vadd.f32 %v1273_v18, %v757_v28 }
 0x174   : > { %v746_v33 = vpop.f32.mrf.mxu1 }
 0x175   : > { %828 = vst.msk [vmem:[%s1280_s7 + $0x1c] sm:$0xf] %vm820_vm7, %v947_v31  ;;  %v782_v34 = vmax.f32 %v773_v32, 0.0 }
 0x176   : > { %v1063_v35 = vpop.f32.mrf.mxu1 }
 0x177   : > { %v948_v9 = vpack.c.bf16 %v782_v34, %v782_v34 }
 0x179   : > { %829 = vst.msk [vmem:[%s1280_s7 + $0x20] sm:$0xf] %vm820_vm7, %v948_v9 }
 0x17a PF: > { %s13_s12 = sadd.s32 1, %s1099_s12  }
 0x17b   : > { %p10_p4 = scmp.ge.s32.totalorder %s13_s12, 4  }
 0x17d   :  { %12 = sbr.rel (!%p10_p4) target bundleno = 1 (0x1), region = 62 }

// kernel: forward.7
= control target key start
LH: loop header
LB: loop body
LE: loop exit
PB: predicated region body
PF: predicated region fallthrough
CT: control target
= control target key end

     0   :  { %s779_s12 = smov 0   ;;  %s847_s0 = inlined_call_operand.vmem [shape: bf16[2,30,64], index: 0, kind: input, shape index: {}]   ;;  %s848_s1 = inlined_call_operand.vmem [shape: bf16[144,32], index: 1, kind: input, shape index: {}]   ;;  %s849_s2 = inlined_call_operand.vmem [shape: f32[1,32], index: 2, kind: input, shape index: {}]   ;;  %s850_s3 = inlined_call_operand.vmem [shape: bf16[2,20,32], index: 3, kind: output, shape index: {}]  }
   0x1 LB: > { %s633_s13 = sadd.s32 4294967295, %s756_s12   ;;  %p637_p0 = scmp.ge.s32.totalorder %s756_s12, 1  ;;  %s756_s12 = sphi %s779_s12, %s13_s12  }
   0x2   : > { %p137_p1 = scmp.lt.s32.totalorder %s756_s12, 3 }
   0x4   : > { %p138_p2 = pnand %p637_p0, %p137_p1 }
   0x5   : > { %p161_p3 = scmp.lt.s32.totalorder (!%p138_p2), %s633_s13, 1  ;;  %s758_s5 = smov (!%p138_p2), 112  }
   0x6   : > { %141 = sbr.rel (%p138_p2) target bundleno = 359 (0x167), region = 32 }
   0xb   : > { %v738_v0 = vld [vmem:[%s848_s1 + $0x18] sm:$0xff]   ;;  %s852_s13 = smov (!%p161_p3, %s633_s13), 1  ;;  %v739_v1 = vld [vmem:[%s848_s1 + $0x10] sm:$0xff]   ;;  %v740_v2 = vld [vmem:[%s848_s1 + $0x28] sm:$0xff]   ;;  %vm378_vm0 = vsmask.f32 5376 }
   0xc   : > { %699 = vmatprep.subr.bf16.mxu1 %v738_v0  ;;  %s670_s20 = sshll.u32 %s852_s13, 4  ;;  %v741_v3 = vld [vmem:[%s848_s1 + $0x8] sm:$0xff]   ;;  %vm475_vm1 = vcmask 1044480   ;;  %691 = vmatprep.subr.bf16.mxu0 %v740_v2  ;;  %v742_v4 = vld [vmem:[%s848_s1 + $0x20] sm:$0xff]   ;;  %vm306_vm2 = vcmask 523264   ;;  %v747_v19 = vld [vmem:[%s848_s1 + $0x38] sm:$0xff]  }
   0xd   : > { %700 = vmatpush3.bf16.msra.mxu1 %v738_v0  ;;  %s805_s25 = scalar_lea.vmem %s847_s0, %s670_s20  ;;  %692 = vmatpush3.bf16.msra.mxu0 %v740_v2  ;;  %v743_v11 = vld [vmem:[%s848_s1] sm:$0xff]   ;;  %vm196_vm3 = vsmask.f32 7424  ;;  %vm224_vm4 = vcmask 261120   ;;  %v748_v39 = vld [vmem:[%s848_s1 + $0x30] sm:$0xff]   ;;  %vm489_vm5 = vcmask 130048  }
   0xe   : > { %701 = vmatprep.subr.bf16.mxu1 %v739_v1  ;;  %v360_v5 = vld [vmem:[%s805_s25] sm:$0xc]  ;;  %v361_v6 = vld [vmem:[%s805_s25 + $0x4] sm:$0xf]  ;;  %v736_v8 = vld [vmem:[%s805_s25 + $0x8] sm:$0x1f]   ;;  %693 = vmatprep.subr.bf16.mxu0 %v742_v4 }
   0xf   : > { %v654_v7 = vcombine.low %v360_v5, %v361_v6  ;;  %v469_v9 = vld [vmem:[%s805_s25] sm:$0x8]  ;;  %v388_v14 = vshrl.u32 %v736_v8, 16  ;;  %v391_v15 = vshll.u32 %v736_v8, 16  ;;  %v477_v17 = vrot.slane %v736_v8, 3  ;;  %s725_s14 = smul.u32 12, %s852_s13 }
  0x10   : > { %v660_v10 = vcombine.low %v469_v9, %v361_v6  ;;  %v744_v18 = vld [vmem:[%s805_s25] sm:$0xff]   ;;  %v745_v25 = vld [vmem:[%s805_s25 + $0x8] ss:$0 sps:$4 sm:$0x77]   ;;  %vm576_vm6 = vcmask 254976   ;;  %vm573_vm7 = vcmask 257024  }
  0x11   : > { %702 = vmatpush3.bf16.msra.mxu1 %v739_v1  ;;  %v380_v12 = vshrl.u32 %v654_v7, 16  ;;  %v383_v13 = vshll.u32 %v654_v7, 16  ;;  %694 = vmatpush3.bf16.msra.mxu0 %v742_v4  ;;  %v390_v22 = vrot.slane %v388_v14, 2  ;;  %v393_v23 = vrot.slane %v391_v15, 3  ;;  %v749_v40 = vld [vmem:[%s848_s1 + $0x40] sm:$0xff]   ;;  %s170_s17 = scalar_lea.vmem %s850_s3, %s725_s14 }
  0x12   : > { %703 = vmatprep.subr.bf16.mxu1 %v741_v3  ;;  %v476_v16 = vrot.slane %v660_v10, 3  ;;  %v198_v26 = vshrl.u32 %v744_v18, 16  ;;  %707 = vmatprep.mubr.msk.bf16.mxu1 %vm306_vm2, %v744_v18  ;;  %v200_v29 = vshll.u32 %v744_v18, 16  ;;  %v746_v30 = vld [vmem:[%s805_s25 + $0x8] ss:$0 sps:$4 sm:$0x33]  }
  0x13   : > { %v382_v20 = vrot.slane %v380_v12, 2  ;;  %v385_v21 = vrot.slane %v383_v13, 3  ;;  %v394_v28 = vor.u32 %v393_v23, %v390_v22  ;;  %711 = vmatprep.subr.bf16.mxu0 %v747_v19  ;;  %v205_v31 = vshll.u32 %v745_v25, 16  ;;  %v664_v61 = vld [vmem:[%s849_s2] ss:$0 sm:$0xff] }
  0x14   : > { %v478_v24 = vsel %vm475_vm1, %v476_v16, %v477_v17  ;;  %v209_v32 = vshrl.u32 %v745_v25, 16  ;;  %v202_v34 = vrot.slane %v200_v29, 1 }
  0x15   : > { %704 = vmatpush3.bf16.msra.mxu1 %v741_v3  ;;  %v386_v27 = vor.u32 %v385_v21, %v382_v20  ;;  %479 = vrot.lane.b32.xlu1 %v478_v24, %s758_s5  ;;  %v207_v35 = vrot.slane %v205_v31, 1 }
  0x16   : > { %705 = vmatprep.subr.bf16.mxu1 %v743_v11  ;;  %v203_v36 = vor.u32 %v202_v34, %v198_v26 }
  0x17   : > { %v395_v33 = vsel %vm378_vm0, %v386_v27, %v394_v28  ;;  %v211_v37 = vor.u32 %v209_v32, %v207_v35 }
  0x18   : > { %396 = vrot.lane.b32.xlu0 %v395_v33, %s758_s5  ;;  %v208_v38 = vsel %vm196_vm3, %v203_v36, %v207_v35 }
  0x19   : > { %706 = vmatpush3.bf16.msra.mxu1 %v743_v11  ;;  %481 = vrot.lane.b32.xlu1 %v477_v17, %s758_s5 }
  0x1a   : > { %695 = vmatprep.mubr.msk.bf16.mxu0 %vm224_vm4, %v208_v38 }
  0x1b   : > { %696 = vmatmul.mubr.msk.bf16.vlgmr.msra.gmra.mxu0 %vm224_vm4, %v211_v37 }
  0x1c   : > { %708 = vmatmul.mubr.msk.bf16.vlgmr.msra.gmra.mxu1 %vm306_vm2, %v746_v30  ;;  %398 = vrot.lane.b32.xlu0 %v394_v28, %s758_s5 }
  0x1d   : > { %712 = vmatpush3.bf16.msra.mxu0 %v747_v19 }
  0x1e   : > { %713 = vmatprep.subr.bf16.mxu0 %v748_v39 }
  0x21   : > { %714 = vmatpush3.bf16.msra.mxu0 %v748_v39 }
  0x22   : > { %719 = vmatprep.subr.bf16.mxu0 %v749_v40 }
  0x87   : > { %v480_v42 = vpop.permute.xlu1 %479 }
  0x8a   : > { %v397_v41 = vpop.permute.xlu0 %396 }
  0x8b   : > { %715 = vmatprep.mubr.msk.bf16.mxu0 %vm224_vm4, %v397_v41  ;;  %v482_v44 = vpop.permute.xlu1 %481 }
  0x8e   : > { %v399_v43 = vpop.permute.xlu0 %398 }
  0x8f   : > { %716 = vmatmul.mubr.msk.bf16.vlgmr.msra.gmra.mxu0 %vm224_vm4, %v399_v43 }
  0x90   : > { %720 = vmatpush3.bf16.msra.mxu0 %v749_v40  ;;  %721 = vmatprep.mubr.msk.bf16.mxu0 %vm489_vm5, %v480_v42 }
  0x97   : > { %722 = vmatmul.mubr.msk.bf16.vlgmr.msra.gmra.mxu0 %vm489_vm5, %v482_v44 }
  0xdb   : > { %v697_v47 = vpop.f32.mrf.mxu0 }
  0xdc   : > { %v709_v45 = vpop.f32.mrf.mxu1 }
  0xdd   : > { %v355_v48 = vadd.f32 %v709_v45, %v697_v47  ;;  %v265_v50 = vpop.f32.mrf.mxu0 }
  0xde   : > { %v346_v46 = vpop.f32.mrf.mxu1 }
  0xdf   : > { %v347_v51 = vadd.f32 %v346_v46, %v265_v50  ;;  %v698_v52 = vpop.f32.mrf.mxu0 }
  0xe0   : > { %v710_v49 = vpop.f32.mrf.mxu1 }
  0xe1   : > { %v268_v53 = vpop.f32.mrf.mxu0 }
  0xe2   : > { %v349_v59 = vpop.f32.mrf.mxu1 }
  0xe3   : > { %v350_v1 = vadd.f32 %v349_v59, %v268_v53 }
 0x14f   : > { %v717_v54 = vpop.f32.mrf.mxu0 }
 0x150   : > { %v468_v58 = vadd.f32 %v717_v54, %v355_v48 }
 0x151   : > { %v452_v55 = vpop.f32.mrf.mxu0 }
 0x152   : > { %v466_v62 = vadd.f32 %v452_v55, %v347_v51 }
 0x153   : > { %v718_v56 = vpop.f32.mrf.mxu0 }
 0x155   : > { %v455_v57 = vpop.f32.mrf.mxu0 }
 0x156   : > { %v467_v5 = vadd.f32 %v455_v57, %v350_v1 }
 0x157   : > { %v723_v60 = vpop.f32.mrf.mxu0 }
 0x158   : > { %v546_v63 = vadd.f32 %v723_v60, %v468_v58 }
 0x159   : > { %v530_v0 = vpop.f32.mrf.mxu0 }
 0x15a   : > { %v556_v2 = vadd.f32 %v664_v61, %v546_v63  ;;  %v544_v3 = vadd.f32 %v530_v0, %v466_v62 }
 0x15b   : > { %v724_v4 = vpop.f32.mrf.mxu0 }
 0x15c   : > { %v559_v6 = vmax.f32 %v556_v2, 0.0  ;;  %v554_v7 = vadd.f32 %v664_v61, %v544_v3 }
 0x15d   : > { %v533_v8 = vpop.f32.mrf.mxu0 }
 0x15e   : > { %v673_v9 = vpack.c.bf16 %v559_v6, %v559_v6  ;;  %v557_v10 = vmax.f32 %v554_v7, 0.0  ;;  %v545_v11 = vadd.f32 %v533_v8, %v467_v5 }
 0x160   : > { %577 = vst.msk [vmem:[%s170_s17 + $0x8] sm:$0x3] %vm576_vm6, %v673_v9  ;;  %v671_v12 = vpack.c.bf16 %v557_v10, %v557_v10  ;;  %v555_v13 = vadd.f32 %v664_v61, %v545_v11 }
 0x162   : > { %574 = vst.msk [vmem:[%s170_s17] sm:$0xf] %vm573_vm7, %v671_v12  ;;  %v558_v14 = vmax.f32 %v555_v13, 0.0 }
 0x164   : > { %v672_v15 = vpack.c.bf16 %v558_v14, %v558_v14 }
 0x166   : > { %575 = vst.msk [vmem:[%s170_s17 + $0x4] sm:$0xf] %vm573_vm7, %v672_v15 }
 0x167 PF: > { %s13_s12 = sadd.s32 1, %s756_s12  }
 0x168   : > { %p10_p4 = scmp.ge.s32.totalorder %s13_s12, 4  }
 0x16a   :  { %12 = sbr.rel (!%p10_p4) target bundleno = 1 (0x1), region = 62 }

// kernel: forward.8
= control target key start
LH: loop header
LB: loop body
LE: loop exit
PB: predicated region body
PF: predicated region fallthrough
CT: control target
= control target key end

     0   :  { %s761_s12 = smov 0   ;;  %s874_s0 = inlined_call_operand.vmem [shape: bf16[2,12,128], index: 0, kind: input, shape index: {}]   ;;  %s875_s1 = inlined_call_operand.vmem [shape: bf16[288,64], index: 1, kind: input, shape index: {}]   ;;  %s876_s2 = inlined_call_operand.vmem [shape: f32[1,64], index: 2, kind: input, shape index: {}]   ;;  %s877_s3 = inlined_call_operand.vmem [shape: bf16[2,6,64], index: 3, kind: output, shape index: {}]  }
   0x1 LB: > { %s588_s13 = sadd.s32 4294967295, %s736_s12   ;;  %p592_p0 = scmp.ge.s32.totalorder %s736_s12, 1  ;;  %s736_s12 = sphi %s761_s12, %s13_s12  }
   0x2   : > { %p137_p1 = scmp.lt.s32.totalorder %s736_s12, 3 }
   0x4   : > { %p138_p2 = pnand %p592_p0, %p137_p1 }
   0x5   : > { %p160_p3 = scmp.lt.s32.totalorder (!%p138_p2), %s588_s13, 1  ;;  %s740_s9 = smov (!%p138_p2), 96  }
   0x6   : > { %141 = sbr.rel (%p138_p2) target bundleno = 348 (0x15c), region = 32 }
   0xb   : > { %v711_v0 = vld [vmem:[%s875_s1 + $0x38] sm:$0xff]   ;;  %v738_v1 = vmov 0.0   ;;  %s879_s13 = smov (!%p160_p3, %s588_s13), 1  ;;  %v712_v2 = vld [vmem:[%s875_s1 + $0x30] sm:$0xff]   ;;  %vm739_vm0 = vmmov 0   ;;  %v713_v6 = vld [vmem:[%s875_s1 + $0x28] sm:$0xff]  }
   0xc   : > { %658 = vmatprep.subr.bf16.mxu1 %v738_v1  ;;  %646 = vmatprep.subr.bf16.mxu0 %v738_v1  ;;  %s623_s18 = sshll.u32 %s879_s13, 3  ;;  %v714_v3 = vld [vmem:[%s875_s1 + $0x58] sm:$0xff]   ;;  %v716_v8 = vld [vmem:[%s875_s1 + $0x50] sm:$0xff]   ;;  %v715_v12 = vld [vmem:[%s875_s1 + $0x20] sm:$0xff]   ;;  %vm230_vm1 = vcmask 523264   ;;  %vm478_vm2 = vcmask 261120  }
   0xd   : > { %659 = vmatpush3.bf16.msra.mxu1 %v711_v0  ;;  %654 = vmatprep.mubr.msk.bf16.mxu0 %vm739_vm0, %v738_v1  ;;  %s791_s23 = scalar_lea.vmem %s874_s0, %s623_s18  ;;  %v718_v13 = vld [vmem:[%s875_s1 + $0x48] sm:$0xff]   ;;  %v717_v19 = vld [vmem:[%s875_s1 + $0x18] sm:$0xff]   ;;  %v720_v20 = vld [vmem:[%s875_s1 + $0x40] sm:$0xff]   ;;  %s595_s5 = sshll.u32 %s879_s13, 2  ;;  %vm533_vm3 = vcmask 518144  }
   0xe   : > { %660 = vmatprep.subr.bf16.mxu1 %v738_v1  ;;  %674 = vmatprep.mubr.msk.bf16.mxu1 %vm739_vm0, %v738_v1  ;;  %v362_v4 = vld [vmem:[%s791_s23] sm:$0xe]  ;;  %v363_v5 = vld [vmem:[%s791_s23 + $0x4] sm:$0x1]  ;;  %v722_v18 = vld [vmem:[%s791_s23] ss:$0 sps:$4 sm:$0xff]   ;;  %s168_s8 = scalar_lea.vmem %s877_s3, %s595_s5 }
   0xf   : > { %647 = vmatpush3.bf16.msra.mxu0 %v714_v3  ;;  %v610_v7 = vcombine.low %v362_v4, %v363_v5  ;;  %v455_v9 = vld [vmem:[%s791_s23] sm:$0xc]  ;;  %v200_v22 = vshrl.u32 %v722_v18, 16  ;;  %v202_v23 = vshll.u32 %v722_v18, 16  ;;  %v719_v24 = vld [vmem:[%s875_s1 + $0x10] sm:$0xff]   ;;  %v724_v26 = vld [vmem:[%s875_s1 + $0x78] sm:$0xff]  }
  0x10   : > { %648 = vmatprep.subr.bf16.mxu0 %v738_v1  ;;  %v616_v16 = vcombine.low %v455_v9, %v363_v5  ;;  %v721_v28 = vld [vmem:[%s875_s1 + $0x8] sm:$0xff]   ;;  %v725_v29 = vld [vmem:[%s875_s1 + $0x70] sm:$0xff]   ;;  %v723_v30 = vld [vmem:[%s875_s1] sm:$0xff]  }
  0x11   : > { %661 = vmatpush3.bf16.msra.mxu1 %v712_v2  ;;  %v378_v10 = vshrl.u32 %v610_v7, 16  ;;  %v381_v11 = vshll.u32 %v610_v7, 16  ;;  %v204_v25 = vrot.slane %v202_v23, 1  ;;  %v726_v31 = vld [vmem:[%s875_s1 + $0x68] sm:$0xff]   ;;  %v170_v32 = vld [vmem:[%s791_s23] sm:$0x7] }
  0x12   : > { %662 = vmatprep.subr.bf16.mxu1 %v738_v1  ;;  %v463_v21 = vrot.slane %v616_v16, 2  ;;  %v727_v33 = vld [vmem:[%s875_s1 + $0x60] sm:$0xff]   ;;  %v728_v34 = vld [vmem:[%s875_s1 + $0x88] sm:$0xff]  }
  0x13   : > { %649 = vmatpush3.bf16.msra.mxu0 %v716_v8  ;;  %v380_v14 = vrot.slane %v378_v10, 1  ;;  %v383_v15 = vrot.slane %v381_v11, 2  ;;  %v205_v27 = vor.u32 %v204_v25, %v200_v22  ;;  %v729_v36 = vld [vmem:[%s875_s1 + $0x80] sm:$0xff]  }
  0x14   : > { %650 = vmatprep.subr.bf16.mxu0 %v738_v1  ;;  %v620_v53 = vld [vmem:[%s876_s2] ss:$0 sm:$0xff] }
  0x15   : > { %663 = vmatpush3.bf16.msra.mxu1 %v713_v6  ;;  %v384_v17 = vor.u32 %v383_v15, %v380_v14 }
  0x16   : > { %664 = vmatprep.subr.bf16.mxu1 %v738_v1 }
  0x17   : > { %651 = vmatpush3.bf16.msra.mxu0 %v718_v13  ;;  %385 = vrot.lane.b32.xlu0 %v384_v17, %s740_s9 }
  0x18   : > { %652 = vmatprep.subr.bf16.mxu0 %v738_v1 }
  0x19   : > { %665 = vmatpush3.bf16.msra.mxu1 %v715_v12 }
  0x1a   : > { %666 = vmatprep.subr.bf16.mxu1 %v738_v1 }
  0x1b   : > { %653 = vmatpush3.bf16.msra.mxu0 %v720_v20  ;;  %464 = vrot.lane.b32.xlu0 %v463_v21, %s740_s9 }
  0x1c   : > { %678 = vmatprep.subr.bf16.mxu0 %v738_v1 }
  0x1d   : > { %667 = vmatpush3.bf16.msra.mxu1 %v717_v19 }
  0x1e   : > { %668 = vmatprep.subr.bf16.mxu1 %v738_v1  ;;  %655 = vmatmul.mubr.msk.bf16.vlgmr.msra.gmra.mxu0 %vm230_vm1, %v205_v27 }
  0x1f   : > { %679 = vmatpush3.bf16.msra.mxu0 %v724_v26  ;;  %686 = vmatprep.mubr.msk.bf16.mxu0 %vm739_vm0, %v738_v1 }
  0x20   : > { %680 = vmatprep.subr.bf16.mxu0 %v738_v1 }
  0x21   : > { %669 = vmatpush3.bf16.msra.mxu1 %v719_v24 }
  0x22   : > { %670 = vmatprep.subr.bf16.mxu1 %v738_v1 }
  0x23   : > { %681 = vmatpush3.bf16.msra.mxu0 %v725_v29 }
  0x24   : > { %682 = vmatprep.subr.bf16.mxu0 %v738_v1 }
  0x25   : > { %671 = vmatpush3.bf16.msra.mxu1 %v721_v28 }
  0x26   : > { %672 = vmatprep.subr.bf16.mxu1 %v738_v1 }
  0x27   : > { %683 = vmatpush3.bf16.msra.mxu0 %v726_v31 }
  0x28   : > { %684 = vmatprep.subr.bf16.mxu0 %v738_v1 }
  0x29   : > { %673 = vmatpush3.bf16.msra.mxu1 %v723_v30 }
  0x2b   : > { %685 = vmatpush3.bf16.msra.mxu0 %v727_v33 }
  0x2c   : > { %675 = vmatmul.mubr.bf16.vlgmr.msra.gmra.mxu1 %v170_v32  ;;  %690 = vmatprep.subr.bf16.mxu0 %v738_v1 }
  0x89   : > { %v386_v35 = vpop.permute.xlu0 %385 }
  0x8a   : > { %687 = vmatmul.mubr.msk.bf16.vlgmr.msra.gmra.mxu0 %vm230_vm1, %v386_v35 }
  0x8b   : > { %691 = vmatpush3.bf16.msra.mxu0 %v728_v34  ;;  %694 = vmatprep.mubr.msk.bf16.mxu0 %vm739_vm0, %v738_v1 }
  0x8c   : > { %692 = vmatprep.subr.bf16.mxu0 %v738_v1 }
  0x8d   : > { %v465_v37 = vpop.permute.xlu0 %464 }
  0x8f   : > { %693 = vmatpush3.bf16.msra.mxu0 %v729_v36 }
  0x92   : > { %695 = vmatmul.mubr.msk.bf16.vlgmr.msra.gmra.mxu0 %vm478_vm2, %v465_v37 }
  0xde   : > { %v268_v38 = vpop.f32.mrf.mxu0 }
  0xe0   : > { %v656_v39 = vpop.f32.mrf.mxu0 }
  0xe2   : > { %v271_v40 = vpop.f32.mrf.mxu0 }
  0xe4   : > { %v657_v41 = vpop.f32.mrf.mxu0 }
  0xec   : > { %v356_v42 = vpop.f32.mrf.mxu1 }
  0xed   : > { %v357_v43 = vadd.f32 %v356_v42, %v268_v38 }
  0xee   : > { %v676_v44 = vpop.f32.mrf.mxu1 }
  0xf0   : > { %v359_v45 = vpop.f32.mrf.mxu1 }
  0xf2   : > { %v677_v46 = vpop.f32.mrf.mxu1 }
 0x14a   : > { %v448_v47 = vpop.f32.mrf.mxu0 }
 0x14b   : > { %v454_v51 = vadd.f32 %v448_v47, %v357_v43 }
 0x14c   : > { %v688_v48 = vpop.f32.mrf.mxu0 }
 0x14e   : > { %v451_v49 = vpop.f32.mrf.mxu0 }
 0x150   : > { %v689_v50 = vpop.f32.mrf.mxu0 }
 0x152   : > { %v516_v52 = vpop.f32.mrf.mxu0 }
 0x153   : > { %v522_v54 = vadd.f32 %v516_v52, %v454_v51 }
 0x154   : > { %v696_v55 = vpop.f32.mrf.mxu0 }
 0x155   : > { %v530_v56 = vadd.f32 %v620_v53, %v522_v54 }
 0x156   : > { %v519_v57 = vpop.f32.mrf.mxu0 }
 0x157   : > { %v531_v58 = vmax.f32 %v530_v56, 0.0 }
 0x158   : > { %v697_v59 = vpop.f32.mrf.mxu0 }
 0x159   : > { %v532_v60 = vpack.c.bf16 %v531_v58, %v531_v58 }
 0x15b   : > { %534 = vst.msk [vmem:[%s168_s8] sm:$0x7] %vm533_vm3, %v532_v60 }
 0x15c PF: > { %s13_s12 = sadd.s32 1, %s736_s12  }
 0x15d   : > { %p10_p4 = scmp.ge.s32.totalorder %s13_s12, 4  }
 0x15f   :  { %12 = sbr.rel (!%p10_p4) target bundleno = 1 (0x1), region = 62 }

// kernel: forward.9
= control target key start
LH: loop header
LB: loop body
LE: loop exit
PB: predicated region body
PF: predicated region fallthrough
CT: control target
= control target key end

     0   :  { %s964_s12 = smov 0   ;;  %s1128_s0 = inlined_call_operand.vmem [shape: bf16[2,6,256], index: 0, kind: input, shape index: {}]   ;;  %s1129_s1 = inlined_call_operand.vmem [shape: bf16[576,128], index: 1, kind: input, shape index: {}]   ;;  %s1130_s2 = inlined_call_operand.vmem [shape: f32[1,128], index: 2, kind: input, shape index: {}]   ;;  %s1131_s3 = inlined_call_operand.vmem [shape: bf16[2,2,128], index: 3, kind: output, shape index: {}]  }
   0x1 LB: > { %s729_s13 = sadd.s32 4294967295, %s939_s12   ;;  %p733_p0 = scmp.ge.s32.totalorder %s939_s12, 1  ;;  %s939_s12 = sphi %s964_s12, %s13_s12  }
   0x2   : > { %p137_p1 = scmp.lt.s32.totalorder %s939_s12, 3 }
   0x4   : > { %p138_p2 = pnand %p733_p0, %p137_p1 }
   0x5   : > { %p159_p3 = scmp.lt.s32.totalorder (!%p138_p2), %s729_s13, 1  ;;  %s943_s9 = smov (!%p138_p2), 64  }
   0x6   : > { %141 = sbr.rel (%p138_p2) target bundleno = 343 (0x157), region = 32 }
   0xb   : > { %v894_v0 = vld [vmem:[%s1129_s1 + $0xb8] sm:$0xff]   ;;  %v941_v1 = vmov 0.0   ;;  %s1133_s13 = smov (!%p159_p3, %s729_s13), 1  ;;  %v897_v4 = vld [vmem:[%s1129_s1 + $0xb0] sm:$0xff]   ;;  %vm942_vm0 = vmmov 0   ;;  %v900_v11 = vld [vmem:[%s1129_s1 + $0xa8] sm:$0xff]  }
   0xc   : > { %828 = vmatprep.subr.bf16.mxu0 %v941_v1  ;;  %v895_v2 = vld [vmem:[%s1129_s1 + $0x78] sm:$0xff]   ;;  %s782_s20 = sshll.u32 %s1133_s13, 3  ;;  %844 = vmatprep.mubr.msk.bf16.mxu0 %vm942_vm0, %v941_v1  ;;  %v898_v5 = vld [vmem:[%s1129_s1 + $0x70] sm:$0xff]   ;;  %v901_v16 = vld [vmem:[%s1129_s1 + $0x68] sm:$0xff]   ;;  %vm488_vm1 = vcmask 523264  }
   0xd   : > { %829 = vmatpush3.bf16.msra.mxu0 %v894_v0  ;;  %v896_v3 = vld [vmem:[%s1129_s1 + $0x38] sm:$0xff]   ;;  %792 = vmatprep.subr.bf16.mxu1 %v895_v2  ;;  %s994_s25 = scalar_lea.vmem %s1128_s0, %s782_s20  ;;  %v899_v7 = vld [vmem:[%s1129_s1 + $0x30] sm:$0xff]   ;;  %v902_v17 = vld [vmem:[%s1129_s1 + $0x28] sm:$0xff]   ;;  %s166_s20 = scalar_lea.vmem %s1131_s3, %s1133_s13 }
   0xe   : > { %830 = vmatprep.subr.bf16.mxu0 %v941_v1  ;;  %793 = vmatpush3.bf16.msra.mxu1 %v896_v3  ;;  %v460_v6 = vld [vmem:[%s994_s25] sm:$0x22]  ;;  %v893_v10 = vld [vmem:[%s994_s25] ss:$0 sps:$4 sm:$0x66]   ;;  %v906_v24 = vld [vmem:[%s1129_s1 + $0x98] sm:$0xff]  }
   0xf   : > { %v763_v8 = vcombine.low %v460_v6, %v460_v6  ;;  %v764_v9 = vcombine.high %v460_v6, %v460_v6  ;;  %794 = vmatprep.subr.bf16.mxu1 %v898_v5  ;;  %v593_v13 = vshrl.u32 %v893_v10, 16  ;;  %v596_v14 = vshll.u32 %v893_v10, 16  ;;  %v903_v20 = vld [vmem:[%s1129_s1 + $0xa0] sm:$0xff]   ;;  %v907_v25 = vld [vmem:[%s1129_s1 + $0x58] sm:$0xff]   ;;  %v909_v27 = vld [vmem:[%s1129_s1 + $0x90] sm:$0xff]  }
  0x10   : > { %v904_v21 = vld [vmem:[%s1129_s1 + $0x60] sm:$0xff]   ;;  %v908_v26 = vld [vmem:[%s1129_s1 + $0x18] sm:$0xff]   ;;  %v910_v28 = vld [vmem:[%s1129_s1 + $0x50] sm:$0xff]  }
  0x11   : > { %831 = vmatpush3.bf16.msra.mxu0 %v897_v4  ;;  %v482_v12 = vrot.slane %v763_v8, 1  ;;  %v483_v15 = vrot.slane %v764_v9, 1  ;;  %v595_v18 = vrot.slane %v593_v13, 1  ;;  %v598_v19 = vrot.slane %v596_v14, 2  ;;  %v905_v23 = vld [vmem:[%s1129_s1 + $0x20] sm:$0xff]   ;;  %v911_v29 = vld [vmem:[%s1129_s1 + $0x10] sm:$0xff]  }
  0x12   : > { %832 = vmatprep.subr.bf16.mxu0 %v941_v1  ;;  %795 = vmatpush3.bf16.msra.mxu1 %v899_v7  ;;  %v912_v30 = vld [vmem:[%s1129_s1 + $0x88] sm:$0xff]   ;;  %v915_v33 = vld [vmem:[%s1129_s1 + $0x80] sm:$0xff]   ;;  %v921_v42 = vld [vmem:[%s1129_s1 + $0xf8] sm:$0xff]  }
  0x13   : > { %484 = vrot.lane.b32.xlu0 %v482_v12, %s943_s9  ;;  %796 = vmatprep.subr.bf16.mxu1 %v901_v16  ;;  %v599_v22 = vor.u32 %v598_v19, %v595_v18  ;;  %v913_v31 = vld [vmem:[%s1129_s1 + $0x48] sm:$0xff]   ;;  %v916_v34 = vld [vmem:[%s1129_s1 + $0x40] sm:$0xff]   ;;  %v925_v45 = vld [vmem:[%s1129_s1 + $0x118] sm:$0xff]  }
  0x14   : > { %v914_v32 = vld [vmem:[%s1129_s1 + $0x8] sm:$0xff]   ;;  %v918_v35 = vld [vmem:[%s994_s25] ss:$0 sps:$4 sm:$0x33]   ;;  %v922_v46 = vld [vmem:[%s1129_s1 + $0xf0] sm:$0xff]  }
  0x15   : > { %833 = vmatpush3.bf16.msra.mxu0 %v900_v11  ;;  %600 = vrot.lane.b32.xlu1 %v599_v22, %s943_s9  ;;  %v168_v36 = vld [vmem:[%s994_s25] sm:$0x11]  ;;  %v222_v37 = vshrl.u32 %v918_v35, 16  ;;  %v224_v38 = vshll.u32 %v918_v35, 16  ;;  %v927_v47 = vld [vmem:[%s1129_s1 + $0x110] sm:$0xff]   ;;  %v923_v48 = vld [vmem:[%s1129_s1 + $0xe8] sm:$0xff]  }
  0x16   : > { %834 = vmatprep.subr.bf16.mxu0 %v941_v1  ;;  %797 = vmatpush3.bf16.msra.mxu1 %v902_v17  ;;  %v746_v39 = vcombine.high %v168_v36, %v168_v36  ;;  %v917_v40 = vld [vmem:[%s1129_s1] sm:$0xff]   ;;  %v745_v44 = vcombine.low %v168_v36, %v168_v36  ;;  %v929_v49 = vld [vmem:[%s1129_s1 + $0x108] sm:$0xff]   ;;  %v926_v52 = vld [vmem:[%s1129_s1 + $0xd8] sm:$0xff]  }
  0x17   : > { %798 = vmatprep.subr.bf16.mxu1 %v904_v21  ;;  %486 = vrot.lane.b32.xlu0 %v483_v15, %s943_s9  ;;  %v226_v41 = vrot.slane %v224_v38, 1  ;;  %v924_v50 = vld [vmem:[%s1129_s1 + $0xe0] sm:$0xff]   ;;  %v928_v53 = vld [vmem:[%s1129_s1 + $0xd0] sm:$0xff]   ;;  %v930_v54 = vld [vmem:[%s1129_s1 + $0xc8] sm:$0xff]  }
  0x18   : > { %452 = vmatprep.mubr.bf16.mxu1 %v746_v39  ;;  %v931_v51 = vld [vmem:[%s1129_s1 + $0x100] sm:$0xff]  }
  0x19   : > { %835 = vmatpush3.bf16.msra.mxu0 %v903_v20  ;;  %v227_v43 = vor.u32 %v226_v41, %v222_v37  ;;  %v932_v55 = vld [vmem:[%s1129_s1 + $0xc0] sm:$0xff]  }
  0x1a   : > { %836 = vmatprep.subr.bf16.mxu0 %v941_v1  ;;  %799 = vmatpush3.bf16.msra.mxu1 %v905_v23  ;;  %v779_v10 = vld [vmem:[%s1130_s2] ss:$0 sm:$0xff] }
  0x1b   : > { %800 = vmatprep.subr.bf16.mxu1 %v907_v25 }
  0x1d   : > { %837 = vmatpush3.bf16.msra.mxu0 %v906_v24 }
  0x1e   : > { %838 = vmatprep.subr.bf16.mxu0 %v941_v1  ;;  %801 = vmatpush3.bf16.msra.mxu1 %v908_v26 }
  0x1f   : > { %802 = vmatprep.subr.bf16.mxu1 %v910_v28 }
  0x21   : > { %839 = vmatpush3.bf16.msra.mxu0 %v909_v27 }
  0x22   : > { %840 = vmatprep.subr.bf16.mxu0 %v941_v1  ;;  %803 = vmatpush3.bf16.msra.mxu1 %v911_v29 }
  0x23   : > { %804 = vmatprep.subr.bf16.mxu1 %v913_v31 }
  0x25   : > { %841 = vmatpush3.bf16.msra.mxu0 %v912_v30 }
  0x26   : > { %842 = vmatprep.subr.bf16.mxu0 %v941_v1  ;;  %805 = vmatpush3.bf16.msra.mxu1 %v914_v32 }
  0x27   : > { %806 = vmatprep.subr.bf16.mxu1 %v916_v34 }
  0x29   : > { %843 = vmatpush3.bf16.msra.mxu0 %v915_v33 }
  0x2a   : > { %848 = vmatprep.subr.bf16.mxu0 %v941_v1  ;;  %807 = vmatpush3.bf16.msra.mxu1 %v917_v40 }
  0x2b   : > { %868 = vmatprep.subr.bf16.mxu1 %v941_v1 }
  0x2c   : > { %845 = vmatmul.mubr.bf16.vlgmr.msra.gmra.mxu0 %v227_v43 }
  0x2d   : > { %849 = vmatpush3.bf16.msra.mxu0 %v921_v42  ;;  %864 = vmatprep.mubr.msk.bf16.mxu0 %vm942_vm0, %v941_v1 }
  0x2e   : > { %453 = vmatmul.mubr.bf16.vlgmr.msra.gmra.mxu1 %v745_v44  ;;  %850 = vmatprep.subr.bf16.mxu0 %v941_v1 }
  0x2f   : > { %869 = vmatpush3.bf16.msra.mxu1 %v925_v45  ;;  %876 = vmatprep.mubr.msk.bf16.mxu1 %vm942_vm0, %v941_v1 }
  0x30   : > { %870 = vmatprep.subr.bf16.mxu1 %v941_v1 }
  0x31   : > { %851 = vmatpush3.bf16.msra.mxu0 %v922_v46 }
  0x32   : > { %852 = vmatprep.subr.bf16.mxu0 %v941_v1 }
  0x33   : > { %871 = vmatpush3.bf16.msra.mxu1 %v927_v47 }
  0x34   : > { %872 = vmatprep.subr.bf16.mxu1 %v941_v1 }
  0x35   : > { %853 = vmatpush3.bf16.msra.mxu0 %v923_v48 }
  0x36   : > { %854 = vmatprep.subr.bf16.mxu0 %v941_v1 }
  0x37   : > { %873 = vmatpush3.bf16.msra.mxu1 %v929_v49 }
  0x38   : > { %874 = vmatprep.subr.bf16.mxu1 %v941_v1 }
  0x39   : > { %855 = vmatpush3.bf16.msra.mxu0 %v924_v50 }
  0x3a   : > { %856 = vmatprep.subr.bf16.mxu0 %v941_v1 }
  0x3b   : > { %875 = vmatpush3.bf16.msra.mxu1 %v931_v51 }
  0x3d   : > { %857 = vmatpush3.bf16.msra.mxu0 %v926_v52 }
  0x3e   : > { %858 = vmatprep.subr.bf16.mxu0 %v941_v1 }
  0x41   : > { %859 = vmatpush3.bf16.msra.mxu0 %v928_v53 }
  0x42   : > { %860 = vmatprep.subr.bf16.mxu0 %v941_v1 }
  0x45   : > { %861 = vmatpush3.bf16.msra.mxu0 %v930_v54 }
  0x46   : > { %862 = vmatprep.subr.bf16.mxu0 %v941_v1 }
  0x49   : > { %863 = vmatpush3.bf16.msra.mxu0 %v932_v55 }
  0x85   : > { %v485_v56 = vpop.permute.xlu0 %484 }
  0x87   : > { %v601_v57 = vpop.permute.xlu1 %600 }
  0x88   : > { %877 = vmatmul.mubr.msk.bf16.vlgmr.msra.gmra.mxu1 %vm488_vm1, %v601_v57 }
  0x89   : > { %v487_v58 = vpop.permute.xlu0 %486 }
  0x8a   : > { %v489_v59 = vsel %vm488_vm1, %v485_v56, %v487_v58 }
  0x8b   : > { %865 = vmatmul.mubr.bf16.vlgmr.msra.gmra.mxu0 %v489_v59 }
  0xec   : > { %v311_v60 = vpop.f32.mrf.mxu0 }
  0xee   : > { %v846_v61 = vpop.f32.mrf.mxu0  ;;  %v808_v62 = vpop.f32.mrf.mxu1 }
  0xf0   : > { %v314_v63 = vpop.f32.mrf.mxu0  ;;  %v809_v0 = vpop.f32.mrf.mxu1 }
  0xf1   : > { %v810_v2 = vadd.f32 %v809_v0, %v808_v62 }
  0xf2   : > { %v847_v3 = vpop.f32.mrf.mxu0  ;;  %v811_v4 = vpop.f32.mrf.mxu1 }
  0xf3   : > { %v455_v5 = vadd.f32 %v810_v2, %v311_v60 }
  0xf4   : > { %v812_v6 = vpop.f32.mrf.mxu1 }
 0x148   : > { %v664_v1 = vpop.f32.mrf.mxu1 }
 0x14a   : > { %v878_v9 = vpop.f32.mrf.mxu1 }
 0x14b   : > { %v573_v7 = vpop.f32.mrf.mxu0 }
 0x14c   : > { %v579_v8 = vadd.f32 %v573_v7, %v455_v5  ;;  %v667_v13 = vpop.f32.mrf.mxu1 }
 0x14d   : > { %v866_v11 = vpop.f32.mrf.mxu0 }
 0x14e   : > { %v670_v12 = vadd.f32 %v664_v1, %v579_v8  ;;  %v879_v16 = vpop.f32.mrf.mxu1 }
 0x14f   : > { %v576_v14 = vpop.f32.mrf.mxu0 }
 0x150   : > { %v678_v15 = vadd.f32 %v779_v10, %v670_v12 }
 0x151   : > { %v867_v17 = vpop.f32.mrf.mxu0 }
 0x152   : > { %v679_v18 = vmax.f32 %v678_v15, 0.0 }
 0x154   : > { %v680_v19 = vpack.c.bf16 %v679_v18, %v679_v18 }
 0x156   : > { %681 = vst [vmem:[%s166_s20] sm:$0x1] %v680_v19 }
 0x157 PF: > { %s13_s12 = sadd.s32 1, %s939_s12  }
 0x158   : > { %p10_p4 = scmp.ge.s32.totalorder %s13_s12, 4  }
 0x15a   :  { %12 = sbr.rel (!%p10_p4) target bundleno = 1 (0x1), region = 62 }

</bundles_post_ra>
